<compile_context>
chip_gen: v7x
topology: tpu7x:2x2x1
jax: 0.10.0
libtpu: 0.0.40
codegen_flags: <defaults>
</compile_context>

<pallas_src>
import functools
import math

import jax
import jax.numpy as jnp
from jax.experimental import pallas as pl
from jax.experimental.pallas import tpu as pltpu  # noqa: F401  (TPU backend module)


# ----------------------------- fused Pallas kernel ------------------------------


def _prediction_kernel(*refs, seq_len, batch, branch_num_layers):
    """Fused forward for both branches (gate-fused weights, interleaved recurrences).

    refs = [x_flat,                                   # (T*B, D)
            # per branch: lin_wt (D,hid), lin_b (1,hid),
            #             (w_ih4 (I,4H), w_hh4 (H,4H), b4 (1,4H)) * num_layers
            ...,
            # outputs, one per branch: (T*B, H)]
    Gate order along the 4H lane axis is PyTorch's (i, f, g, o).
    """
    T, B = seq_len, batch
    n_branches = len(branch_num_layers)
    x_flat = refs[0][...].astype(jnp.float32)          # (T*B, D)
    out_refs = refs[len(refs) - n_branches:]

    # ---- unpack (tiny) parameters once
    pos = 1
    branch_lin = []
    branch_layers = []
    for n_layers in branch_num_layers:
        branch_lin.append((refs[pos][...], refs[pos + 1][...]))
        layers = []
        p = pos + 2
        for _ in range(n_layers):
            layers.append((refs[p][...], refs[p + 1][...], refs[p + 2][...]))
            p += 3
        branch_layers.append(layers)
        pos = p

    # ---- hoisted Linear projection: ONE dot per branch over all T*B rows
    xs = [jnp.dot(x_flat, wt, preferred_element_type=jnp.float32) + b
          for (wt, b) in branch_lin]                   # each (T*B, hid)

    n_layers = branch_num_layers[0]                    # equal depth (asserted in wrapper)
    for l in range(n_layers):
        # hoisted, gate-fused input projections for ALL timesteps (off the serial chain):
        # one (T*B, I) @ (I, 4H) dot per branch.
        gins = []
        hcs = []
        for b_idx in range(n_branches):
            w_ih4, w_hh4, b4 = branch_layers[b_idx][l]
            gins.append(jnp.dot(xs[b_idx], w_ih4,
                                preferred_element_type=jnp.float32) + b4)   # (T*B, 4H)
            H = w_hh4.shape[0]
            hcs.append((jnp.zeros((B, H), jnp.float32),
                        jnp.zeros((B, H), jnp.float32)))

        hs = [[] for _ in range(n_branches)]
        # Interleaved recurrence: both branches' steps share one basic block so the LLO
        # scheduler overlaps one branch's gating with the other's matmul drain.
        for t in range(T):
            for b_idx in range(n_branches):
                _, w_hh4, _ = branch_layers[b_idx][l]
                H = w_hh4.shape[0]
                h, c = hcs[b_idx]
                # single gate-fused recurrent matmul per step (i|f|g|o concatenated on lanes)
                pre = gins[b_idx][t * B:(t + 1) * B, :] + jnp.dot(
                    h, w_hh4, preferred_element_type=jnp.float32)           # (B, 4H)
                sig = jax.nn.sigmoid(pre)              # one EUP push covers all 4 gates
                i_g = sig[:, 0:H]
                f_g = sig[:, H:2 * H]
                o_g = sig[:, 3 * H:4 * H]
                g_g = jnp.tanh(pre[:, 2 * H:3 * H])
                c = f_g * c + i_g * g_g
                h = o_g * jnp.tanh(c)
                hcs[b_idx] = (h, c)
                hs[b_idx].append(h)

        # layer l output sequence feeds layer l+1 (flattened over time for the next hoisted dot)
        xs = [jnp.concatenate(h_list, axis=0) for h_list in hs]             # (T*B, H)

    # ---- single lane-contiguous block store per branch (no per-timestep masked stores)
    for b_idx in range(n_branches):
        out_refs[b_idx][...] = xs[b_idx].astype(out_refs[b_idx].dtype)


# ------------------------------- forward wrapper -------------------------------


def prediction_function(state_normalized, policy_params, value_params):
    """Returns (policy_sequence, value_sequence), each (T, B, H_branch)."""
    T, B, D = state_normalized.shape
    branches = (policy_params, value_params)

    flat_args = [state_normalized.reshape(T * B, D)]
    out_shapes = []
    num_layers = []
    hiddens = []
    for (lin_wt, lin_b, layers) in branches:
        flat_args.extend([lin_wt, lin_b])
        for layer in layers:
            flat_args.extend(layer)
        num_layers.append(len(layers))
        hiddens.append(layers[-1][1].shape[0])          # w_hh4 is (H, 4H)
        out_shapes.append(
            jax.ShapeDtypeStruct((T * B, hiddens[-1]), state_normalized.dtype))

    assert len(set(num_layers)) == 1, "branch interleaving assumes equal LSTM depth"

    kernel = functools.partial(
        _prediction_kernel, seq_len=T, batch=B, branch_num_layers=tuple(num_layers))

    # Whole problem is a few KiB: no grid, every operand lives wholly in VMEM, one launch.
    outs = pl.pallas_call(kernel, out_shape=tuple(out_shapes))(*flat_args)
    # (T*B, H) -> (T, B, H) happens in the XLA wrapper (free layout change).
    return tuple(o.reshape(T, B, h) for o, h in zip(outs, hiddens))


# --------------------------- parameter construction -----------------------------


def _uniform(key, shape, bound):
    return jax.random.uniform(key, shape, jnp.float32, -bound, bound)


def init_branch(key, state_dim, hidden_dim, lstm_hidden, num_layers):
    """Mirrors nn.Linear(state_dim, hidden_dim) + nn.LSTM(hidden_dim, lstm_hidden, num_layers).

    Re-laid-out for the kernel (gate order i, f, g, o, concatenated along the last axis):
      lin_wt : (state_dim, hidden_dim)   lin_b : (1, hidden_dim)
      per LSTM layer:
        w_ih4 : (in_size, 4H)  transposed, gate-concatenated
        w_hh4 : (H, 4H)        transposed, gate-concatenated
        b4    : (1, 4H)        b_ih + b_hh fused
    """
    keys = jax.random.split(key, 2 + 4 * num_layers)
    lin_bound = 1.0 / math.sqrt(state_dim)
    lin_w = _uniform(keys[0], (hidden_dim, state_dim), lin_bound)  # (out, in) like PyTorch
    lin_b = _uniform(keys[1], (hidden_dim,), lin_bound)

    H = lstm_hidden
    layers = []
    for layer in range(num_layers):
        in_size = hidden_dim if layer == 0 else H
        bound = 1.0 / math.sqrt(H)
        k0, k1, k2, k3 = keys[2 + 4 * layer: 6 + 4 * layer]
        w_ih = _uniform(k0, (4 * H, in_size), bound)   # PyTorch layout (4H, in)
        w_hh = _uniform(k1, (4 * H, H), bound)
        b_ih = _uniform(k2, (4 * H,), bound)
        b_hh = _uniform(k3, (4 * H,), bound)
        layers.append((w_ih.T, w_hh.T, (b_ih + b_hh)[None, :]))
    return (lin_w.T, lin_b[None, :], layers)


# ------------------------------ pure-JAX reference ------------------------------


def branch_ref(x, params):
    lin_wt, lin_b, layers = params
    out = x @ lin_wt + lin_b            # (T, B, hid)
    for (w_ih4, w_hh4, b4) in layers:
        hidden = w_hh4.shape[0]
        batch = out.shape[1]

        def step(carry, x_t, w_ih4=w_ih4, w_hh4=w_hh4, b4=b4, H=hidden):
            h, c = carry
            pre = x_t @ w_ih4 + h @ w_hh4 + b4
            i = jax.nn.sigmoid(pre[:, 0:H])
            f = jax.nn.sigmoid(pre[:, H:2 * H])
            g_ = jnp.tanh(pre[:, 2 * H:3 * H])
            o = jax.nn.sigmoid(pre[:, 3 * H:4 * H])
            c = f * c + i * g_
            h = o * jnp.tanh(c)
            return (h, c), h

        init = (jnp.zeros((batch, hidden), jnp.float32),
                jnp.zeros((batch, hidden), jnp.float32))
        _, out = jax.lax.scan(step, init, out)
    return out


# ----------------------------------- main ---------------------------------------

if __name__ == "__main__":
    state_dimension = 8
    action_dimension = 4
    hidden_layer_dimensions = 32
    number_of_hidden_layer = 2
    seq_len, batch = 8, 2

    root = jax.random.PRNGKey(0)
    k_x, k_pol, k_val = jax.random.split(root, 3)

    # state_normalized: (seq_len, batch, state_dim)
    x = jax.random.normal(k_x, (seq_len, batch, state_dimension), jnp.float32)

    policy_params = init_branch(k_pol, state_dimension, hidden_layer_dimensions,
                                action_dimension, number_of_hidden_layer)
    value_params = init_branch(k_val, state_dimension, hidden_layer_dimensions,
                               state_dimension, number_of_hidden_layer)

    policy_out, value_out = prediction_function(x, policy_params, value_params)
    jax.block_until_ready((policy_out, value_out))

    assert policy_out.shape == (seq_len, batch, action_dimension)
    assert value_out.shape == (seq_len, batch, state_dimension)

    # correctness check against a pure-JAX reference
    pol_ref = branch_ref(x, policy_params)
    val_ref = branch_ref(x, value_params)
    assert jnp.allclose(policy_out, pol_ref, atol=1e-4, rtol=1e-4)
    assert jnp.allclose(value_out, val_ref, atol=1e-4, rtol=1e-4)

    print("KERNEL_OK")
</pallas_src>

<mosaic_0001>
module attributes {stable_mosaic.version = 11 : i64} {
  func.func @_prediction_kernel(%arg0: memref<16x8xf32, #tpu.memory_space<vmem>>, %arg1: memref<8x32xf32, #tpu.memory_space<vmem>>, %arg2: memref<1x32xf32, #tpu.memory_space<vmem>>, %arg3: memref<32x16xf32, #tpu.memory_space<vmem>>, %arg4: memref<4x16xf32, #tpu.memory_space<vmem>>, %arg5: memref<1x16xf32, #tpu.memory_space<vmem>>, %arg6: memref<4x16xf32, #tpu.memory_space<vmem>>, %arg7: memref<4x16xf32, #tpu.memory_space<vmem>>, %arg8: memref<1x16xf32, #tpu.memory_space<vmem>>, %arg9: memref<8x32xf32, #tpu.memory_space<vmem>>, %arg10: memref<1x32xf32, #tpu.memory_space<vmem>>, %arg11: memref<32x32xf32, #tpu.memory_space<vmem>>, %arg12: memref<8x32xf32, #tpu.memory_space<vmem>>, %arg13: memref<1x32xf32, #tpu.memory_space<vmem>>, %arg14: memref<8x32xf32, #tpu.memory_space<vmem>>, %arg15: memref<8x32xf32, #tpu.memory_space<vmem>>, %arg16: memref<1x32xf32, #tpu.memory_space<vmem>>, %arg17: memref<16x4xf32, #tpu.memory_space<vmem>>, %arg18: memref<16x8xf32, #tpu.memory_space<vmem>>) attributes {dimension_semantics = [], scalar_prefetch = 0 : i64, scratch_operands = 0 : i64, tpu.core_type = #tpu.core_type<tc>} {
    %c0 = arith.constant 0 : index
    %c0_0 = arith.constant 0 : index
    %0 = vector.load %arg0[%c0, %c0_0] : memref<16x8xf32, #tpu.memory_space<vmem>>, vector<16x8xf32>
    %c0_1 = arith.constant 0 : index
    %c0_2 = arith.constant 0 : index
    %1 = vector.load %arg1[%c0_1, %c0_2] : memref<8x32xf32, #tpu.memory_space<vmem>>, vector<8x32xf32>
    %c0_3 = arith.constant 0 : index
    %c0_4 = arith.constant 0 : index
    %2 = vector.load %arg2[%c0_3, %c0_4] : memref<1x32xf32, #tpu.memory_space<vmem>>, vector<1x32xf32>
    %c0_5 = arith.constant 0 : index
    %c0_6 = arith.constant 0 : index
    %3 = vector.load %arg3[%c0_5, %c0_6] : memref<32x16xf32, #tpu.memory_space<vmem>>, vector<32x16xf32>
    %c0_7 = arith.constant 0 : index
    %c0_8 = arith.constant 0 : index
    %4 = vector.load %arg4[%c0_7, %c0_8] : memref<4x16xf32, #tpu.memory_space<vmem>>, vector<4x16xf32>
    %c0_9 = arith.constant 0 : index
    %c0_10 = arith.constant 0 : index
    %5 = vector.load %arg5[%c0_9, %c0_10] : memref<1x16xf32, #tpu.memory_space<vmem>>, vector<1x16xf32>
    %c0_11 = arith.constant 0 : index
    %c0_12 = arith.constant 0 : index
    %6 = vector.load %arg6[%c0_11, %c0_12] : memref<4x16xf32, #tpu.memory_space<vmem>>, vector<4x16xf32>
    %c0_13 = arith.constant 0 : index
    %c0_14 = arith.constant 0 : index
    %7 = vector.load %arg7[%c0_13, %c0_14] : memref<4x16xf32, #tpu.memory_space<vmem>>, vector<4x16xf32>
    %c0_15 = arith.constant 0 : index
    %c0_16 = arith.constant 0 : index
    %8 = vector.load %arg8[%c0_15, %c0_16] : memref<1x16xf32, #tpu.memory_space<vmem>>, vector<1x16xf32>
    %c0_17 = arith.constant 0 : index
    %c0_18 = arith.constant 0 : index
    %9 = vector.load %arg9[%c0_17, %c0_18] : memref<8x32xf32, #tpu.memory_space<vmem>>, vector<8x32xf32>
    %c0_19 = arith.constant 0 : index
    %c0_20 = arith.constant 0 : index
    %10 = vector.load %arg10[%c0_19, %c0_20] : memref<1x32xf32, #tpu.memory_space<vmem>>, vector<1x32xf32>
    %c0_21 = arith.constant 0 : index
    %c0_22 = arith.constant 0 : index
    %11 = vector.load %arg11[%c0_21, %c0_22] : memref<32x32xf32, #tpu.memory_space<vmem>>, vector<32x32xf32>
    %c0_23 = arith.constant 0 : index
    %c0_24 = arith.constant 0 : index
    %12 = vector.load %arg12[%c0_23, %c0_24] : memref<8x32xf32, #tpu.memory_space<vmem>>, vector<8x32xf32>
    %c0_25 = arith.constant 0 : index
    %c0_26 = arith.constant 0 : index
    %13 = vector.load %arg13[%c0_25, %c0_26] : memref<1x32xf32, #tpu.memory_space<vmem>>, vector<1x32xf32>
    %c0_27 = arith.constant 0 : index
    %c0_28 = arith.constant 0 : index
    %14 = vector.load %arg14[%c0_27, %c0_28] : memref<8x32xf32, #tpu.memory_space<vmem>>, vector<8x32xf32>
    %c0_29 = arith.constant 0 : index
    %c0_30 = arith.constant 0 : index
    %15 = vector.load %arg15[%c0_29, %c0_30] : memref<8x32xf32, #tpu.memory_space<vmem>>, vector<8x32xf32>
    %c0_31 = arith.constant 0 : index
    %c0_32 = arith.constant 0 : index
    %16 = vector.load %arg16[%c0_31, %c0_32] : memref<1x32xf32, #tpu.memory_space<vmem>>, vector<1x32xf32>
    %cst = arith.constant dense<0.000000e+00> : vector<16x32xf32>
    %17 = tpu.matmul %0, %1, %cst {dimension_numbers = #tpu.dot_dimension_numbers<[1], [0], [0], [1], [0, 0, 1, 1], [], []>} : vector<16x8xf32>, vector<8x32xf32>, vector<16x32xf32> -> vector<16x32xf32>
    %18 = vector.broadcast %2 : vector<1x32xf32> to vector<16x32xf32>
    %19 = arith.addf %17, %18 : vector<16x32xf32>
    %cst_33 = arith.constant dense<0.000000e+00> : vector<16x32xf32>
    %20 = tpu.matmul %0, %9, %cst_33 {dimension_numbers = #tpu.dot_dimension_numbers<[1], [0], [0], [1], [0, 0, 1, 1], [], []>} : vector<16x8xf32>, vector<8x32xf32>, vector<16x32xf32> -> vector<16x32xf32>
    %21 = vector.broadcast %10 : vector<1x32xf32> to vector<16x32xf32>
    %22 = arith.addf %20, %21 : vector<16x32xf32>
    %cst_34 = arith.constant dense<0.000000e+00> : vector<16x16xf32>
    %23 = tpu.matmul %19, %3, %cst_34 {dimension_numbers = #tpu.dot_dimension_numbers<[1], [0], [0], [1], [0, 0, 1, 1], [], []>} : vector<16x32xf32>, vector<32x16xf32>, vector<16x16xf32> -> vector<16x16xf32>
    %24 = vector.broadcast %5 : vector<1x16xf32> to vector<16x16xf32>
    %25 = arith.addf %23, %24 : vector<16x16xf32>
    %cst_35 = arith.constant 0.000000e+00 : f32
    %26 = vector.broadcast %cst_35 : f32 to vector<2x4xf32>
    %cst_36 = arith.constant 0.000000e+00 : f32
    %27 = vector.broadcast %cst_36 : f32 to vector<2x4xf32>
    %cst_37 = arith.constant dense<0.000000e+00> : vector<16x32xf32>
    %28 = tpu.matmul %22, %11, %cst_37 {dimension_numbers = #tpu.dot_dimension_numbers<[1], [0], [0], [1], [0, 0, 1, 1], [], []>} : vector<16x32xf32>, vector<32x32xf32>, vector<16x32xf32> -> vector<16x32xf32>
    %29 = vector.broadcast %13 : vector<1x32xf32> to vector<16x32xf32>
    %30 = arith.addf %28, %29 : vector<16x32xf32>
    %cst_38 = arith.constant 0.000000e+00 : f32
    %31 = vector.broadcast %cst_38 : f32 to vector<2x8xf32>
    %cst_39 = arith.constant 0.000000e+00 : f32
    %32 = vector.broadcast %cst_39 : f32 to vector<2x8xf32>
    %33 = vector.extract_strided_slice %25 {offsets = [0, 0], sizes = [2, 16], strides = [1, 1]} : vector<16x16xf32> to vector<2x16xf32>
    %cst_40 = arith.constant dense<0.000000e+00> : vector<2x16xf32>
    %34 = tpu.matmul %26, %4, %cst_40 {dimension_numbers = #tpu.dot_dimension_numbers<[1], [0], [0], [1], [0, 0, 1, 1], [], []>} : vector<2x4xf32>, vector<4x16xf32>, vector<2x16xf32> -> vector<2x16xf32>
    %35 = arith.addf %33, %34 : vector<2x16xf32>
    %36 = arith.negf %35 : vector<2x16xf32>
    %37 = math.exp %36 : vector<2x16xf32>
    %cst_41 = arith.constant 1.000000e+00 : f32
    %38 = vector.broadcast %cst_41 : f32 to vector<2x16xf32>
    %39 = arith.addf %38, %37 : vector<2x16xf32>
    %40 = arith.divf %38, %39 : vector<2x16xf32>
    %41 = vector.extract_strided_slice %40 {offsets = [0, 0], sizes = [2, 4], strides = [1, 1]} : vector<2x16xf32> to vector<2x4xf32>
    %42 = vector.extract_strided_slice %40 {offsets = [0, 4], sizes = [2, 4], strides = [1, 1]} : vector<2x16xf32> to vector<2x4xf32>
    %43 = vector.extract_strided_slice %40 {offsets = [0, 12], sizes = [2, 4], strides = [1, 1]} : vector<2x16xf32> to vector<2x4xf32>
    %44 = vector.extract_strided_slice %35 {offsets = [0, 8], sizes = [2, 4], strides = [1, 1]} : vector<2x16xf32> to vector<2x4xf32>
    %45 = math.tanh %44 : vector<2x4xf32>
    %46 = arith.mulf %42, %27 : vector<2x4xf32>
    %47 = arith.mulf %41, %45 : vector<2x4xf32>
    %48 = arith.addf %46, %47 : vector<2x4xf32>
    %49 = math.tanh %48 : vector<2x4xf32>
    %50 = arith.mulf %43, %49 : vector<2x4xf32>
    %51 = vector.extract_strided_slice %30 {offsets = [0, 0], sizes = [2, 32], strides = [1, 1]} : vector<16x32xf32> to vector<2x32xf32>
    %cst_42 = arith.constant dense<0.000000e+00> : vector<2x32xf32>
    %52 = tpu.matmul %31, %12, %cst_42 {dimension_numbers = #tpu.dot_dimension_numbers<[1], [0], [0], [1], [0, 0, 1, 1], [], []>} : vector<2x8xf32>, vector<8x32xf32>, vector<2x32xf32> -> vector<2x32xf32>
    %53 = arith.addf %51, %52 : vector<2x32xf32>
    %54 = arith.negf %53 : vector<2x32xf32>
    %55 = math.exp %54 : vector<2x32xf32>
    %cst_43 = arith.constant 1.000000e+00 : f32
    %56 = vector.broadcast %cst_43 : f32 to vector<2x32xf32>
    %57 = arith.addf %56, %55 : vector<2x32xf32>
    %58 = arith.divf %56, %57 : vector<2x32xf32>
    %59 = vector.extract_strided_slice %58 {offsets = [0, 0], sizes = [2, 8], strides = [1, 1]} : vector<2x32xf32> to vector<2x8xf32>
    %60 = vector.extract_strided_slice %58 {offsets = [0, 8], sizes = [2, 8], strides = [1, 1]} : vector<2x32xf32> to vector<2x8xf32>
    %61 = vector.extract_strided_slice %58 {offsets = [0, 24], sizes = [2, 8], strides = [1, 1]} : vector<2x32xf32> to vector<2x8xf32>
    %62 = vector.extract_strided_slice %53 {offsets = [0, 16], sizes = [2, 8], strides = [1, 1]} : vector<2x32xf32> to vector<2x8xf32>
    %63 = math.tanh %62 : vector<2x8xf32>
    %64 = arith.mulf %60, %32 : vector<2x8xf32>
    %65 = arith.mulf %59, %63 : vector<2x8xf32>
    %66 = arith.addf %64, %65 : vector<2x8xf32>
    %67 = math.tanh %66 : vector<2x8xf32>
    %68 = arith.mulf %61, %67 : vector<2x8xf32>
    %69 = vector.extract_strided_slice %25 {offsets = [2, 0], sizes = [2, 16], strides = [1, 1]} : vector<16x16xf32> to vector<2x16xf32>
    %cst_44 = arith.constant dense<0.000000e+00> : vector<2x16xf32>
    %70 = tpu.matmul %50, %4, %cst_44 {dimension_numbers = #tpu.dot_dimension_numbers<[1], [0], [0], [1], [0, 0, 1, 1], [], []>} : vector<2x4xf32>, vector<4x16xf32>, vector<2x16xf32> -> vector<2x16xf32>
    %71 = arith.addf %69, %70 : vector<2x16xf32>
    %72 = arith.negf %71 : vector<2x16xf32>
    %73 = math.exp %72 : vector<2x16xf32>
    %cst_45 = arith.constant 1.000000e+00 : f32
    %74 = vector.broadcast %cst_45 : f32 to vector<2x16xf32>
    %75 = arith.addf %74, %73 : vector<2x16xf32>
    %76 = arith.divf %74, %75 : vector<2x16xf32>
    %77 = vector.extract_strided_slice %76 {offsets = [0, 0], sizes = [2, 4], strides = [1, 1]} : vector<2x16xf32> to vector<2x4xf32>
    %78 = vector.extract_strided_slice %76 {offsets = [0, 4], sizes = [2, 4], strides = [1, 1]} : vector<2x16xf32> to vector<2x4xf32>
    %79 = vector.extract_strided_slice %76 {offsets = [0, 12], sizes = [2, 4], strides = [1, 1]} : vector<2x16xf32> to vector<2x4xf32>
    %80 = vector.extract_strided_slice %71 {offsets = [0, 8], sizes = [2, 4], strides = [1, 1]} : vector<2x16xf32> to vector<2x4xf32>
    %81 = math.tanh %80 : vector<2x4xf32>
    %82 = arith.mulf %78, %48 : vector<2x4xf32>
    %83 = arith.mulf %77, %81 : vector<2x4xf32>
    %84 = arith.addf %82, %83 : vector<2x4xf32>
    %85 = math.tanh %84 : vector<2x4xf32>
    %86 = arith.mulf %79, %85 : vector<2x4xf32>
    %87 = vector.extract_strided_slice %30 {offsets = [2, 0], sizes = [2, 32], strides = [1, 1]} : vector<16x32xf32> to vector<2x32xf32>
    %cst_46 = arith.constant dense<0.000000e+00> : vector<2x32xf32>
    %88 = tpu.matmul %68, %12, %cst_46 {dimension_numbers = #tpu.dot_dimension_numbers<[1], [0], [0], [1], [0, 0, 1, 1], [], []>} : vector<2x8xf32>, vector<8x32xf32>, vector<2x32xf32> -> vector<2x32xf32>
    %89 = arith.addf %87, %88 : vector<2x32xf32>
    %90 = arith.negf %89 : vector<2x32xf32>
    %91 = math.exp %90 : vector<2x32xf32>
    %cst_47 = arith.constant 1.000000e+00 : f32
    %92 = vector.broadcast %cst_47 : f32 to vector<2x32xf32>
    %93 = arith.addf %92, %91 : vector<2x32xf32>
    %94 = arith.divf %92, %93 : vector<2x32xf32>
    %95 = vector.extract_strided_slice %94 {offsets = [0, 0], sizes = [2, 8], strides = [1, 1]} : vector<2x32xf32> to vector<2x8xf32>
    %96 = vector.extract_strided_slice %94 {offsets = [0, 8], sizes = [2, 8], strides = [1, 1]} : vector<2x32xf32> to vector<2x8xf32>
    %97 = vector.extract_strided_slice %94 {offsets = [0, 24], sizes = [2, 8], strides = [1, 1]} : vector<2x32xf32> to vector<2x8xf32>
    %98 = vector.extract_strided_slice %89 {offsets = [0, 16], sizes = [2, 8], strides = [1, 1]} : vector<2x32xf32> to vector<2x8xf32>
    %99 = math.tanh %98 : vector<2x8xf32>
    %100 = arith.mulf %96, %66 : vector<2x8xf32>
    %101 = arith.mulf %95, %99 : vector<2x8xf32>
    %102 = arith.addf %100, %101 : vector<2x8xf32>
    %103 = math.tanh %102 : vector<2x8xf32>
    %104 = arith.mulf %97, %103 : vector<2x8xf32>
    %105 = vector.extract_strided_slice %25 {offsets = [4, 0], sizes = [2, 16], strides = [1, 1]} : vector<16x16xf32> to vector<2x16xf32>
    %cst_48 = arith.constant dense<0.000000e+00> : vector<2x16xf32>
    %106 = tpu.matmul %86, %4, %cst_48 {dimension_numbers = #tpu.dot_dimension_numbers<[1], [0], [0], [1], [0, 0, 1, 1], [], []>} : vector<2x4xf32>, vector<4x16xf32>, vector<2x16xf32> -> vector<2x16xf32>
    %107 = arith.addf %105, %106 : vector<2x16xf32>
    %108 = arith.negf %107 : vector<2x16xf32>
    %109 = math.exp %108 : vector<2x16xf32>
    %cst_49 = arith.constant 1.000000e+00 : f32
    %110 = vector.broadcast %cst_49 : f32 to vector<2x16xf32>
    %111 = arith.addf %110, %109 : vector<2x16xf32>
    %112 = arith.divf %110, %111 : vector<2x16xf32>
    %113 = vector.extract_strided_slice %112 {offsets = [0, 0], sizes = [2, 4], strides = [1, 1]} : vector<2x16xf32> to vector<2x4xf32>
    %114 = vector.extract_strided_slice %112 {offsets = [0, 4], sizes = [2, 4], strides = [1, 1]} : vector<2x16xf32> to vector<2x4xf32>
    %115 = vector.extract_strided_slice %112 {offsets = [0, 12], sizes = [2, 4], strides = [1, 1]} : vector<2x16xf32> to vector<2x4xf32>
    %116 = vector.extract_strided_slice %107 {offsets = [0, 8], sizes = [2, 4], strides = [1, 1]} : vector<2x16xf32> to vector<2x4xf32>
    %117 = math.tanh %116 : vector<2x4xf32>
    %118 = arith.mulf %114, %84 : vector<2x4xf32>
    %119 = arith.mulf %113, %117 : vector<2x4xf32>
    %120 = arith.addf %118, %119 : vector<2x4xf32>
    %121 = math.tanh %120 : vector<2x4xf32>
    %122 = arith.mulf %115, %121 : vector<2x4xf32>
    %123 = vector.extract_strided_slice %30 {offsets = [4, 0], sizes = [2, 32], strides = [1, 1]} : vector<16x32xf32> to vector<2x32xf32>
    %cst_50 = arith.constant dense<0.000000e+00> : vector<2x32xf32>
    %124 = tpu.matmul %104, %12, %cst_50 {dimension_numbers = #tpu.dot_dimension_numbers<[1], [0], [0], [1], [0, 0, 1, 1], [], []>} : vector<2x8xf32>, vector<8x32xf32>, vector<2x32xf32> -> vector<2x32xf32>
    %125 = arith.addf %123, %124 : vector<2x32xf32>
    %126 = arith.negf %125 : vector<2x32xf32>
    %127 = math.exp %126 : vector<2x32xf32>
    %cst_51 = arith.constant 1.000000e+00 : f32
    %128 = vector.broadcast %cst_51 : f32 to vector<2x32xf32>
    %129 = arith.addf %128, %127 : vector<2x32xf32>
    %130 = arith.divf %128, %129 : vector<2x32xf32>
    %131 = vector.extract_strided_slice %130 {offsets = [0, 0], sizes = [2, 8], strides = [1, 1]} : vector<2x32xf32> to vector<2x8xf32>
    %132 = vector.extract_strided_slice %130 {offsets = [0, 8], sizes = [2, 8], strides = [1, 1]} : vector<2x32xf32> to vector<2x8xf32>
    %133 = vector.extract_strided_slice %130 {offsets = [0, 24], sizes = [2, 8], strides = [1, 1]} : vector<2x32xf32> to vector<2x8xf32>
    %134 = vector.extract_strided_slice %125 {offsets = [0, 16], sizes = [2, 8], strides = [1, 1]} : vector<2x32xf32> to vector<2x8xf32>
    %135 = math.tanh %134 : vector<2x8xf32>
    %136 = arith.mulf %132, %102 : vector<2x8xf32>
    %137 = arith.mulf %131, %135 : vector<2x8xf32>
    %138 = arith.addf %136, %137 : vector<2x8xf32>
    %139 = math.tanh %138 : vector<2x8xf32>
    %140 = arith.mulf %133, %139 : vector<2x8xf32>
    %141 = vector.extract_strided_slice %25 {offsets = [6, 0], sizes = [2, 16], strides = [1, 1]} : vector<16x16xf32> to vector<2x16xf32>
    %cst_52 = arith.constant dense<0.000000e+00> : vector<2x16xf32>
    %142 = tpu.matmul %122, %4, %cst_52 {dimension_numbers = #tpu.dot_dimension_numbers<[1], [0], [0], [1], [0, 0, 1, 1], [], []>} : vector<2x4xf32>, vector<4x16xf32>, vector<2x16xf32> -> vector<2x16xf32>
    %143 = arith.addf %141, %142 : vector<2x16xf32>
    %144 = arith.negf %143 : vector<2x16xf32>
    %145 = math.exp %144 : vector<2x16xf32>
    %cst_53 = arith.constant 1.000000e+00 : f32
    %146 = vector.broadcast %cst_53 : f32 to vector<2x16xf32>
    %147 = arith.addf %146, %145 : vector<2x16xf32>
    %148 = arith.divf %146, %147 : vector<2x16xf32>
    %149 = vector.extract_strided_slice %148 {offsets = [0, 0], sizes = [2, 4], strides = [1, 1]} : vector<2x16xf32> to vector<2x4xf32>
    %150 = vector.extract_strided_slice %148 {offsets = [0, 4], sizes = [2, 4], strides = [1, 1]} : vector<2x16xf32> to vector<2x4xf32>
    %151 = vector.extract_strided_slice %148 {offsets = [0, 12], sizes = [2, 4], strides = [1, 1]} : vector<2x16xf32> to vector<2x4xf32>
    %152 = vector.extract_strided_slice %143 {offsets = [0, 8], sizes = [2, 4], strides = [1, 1]} : vector<2x16xf32> to vector<2x4xf32>
    %153 = math.tanh %152 : vector<2x4xf32>
    %154 = arith.mulf %150, %120 : vector<2x4xf32>
    %155 = arith.mulf %149, %153 : vector<2x4xf32>
    %156 = arith.addf %154, %155 : vector<2x4xf32>
    %157 = math.tanh %156 : vector<2x4xf32>
    %158 = arith.mulf %151, %157 : vector<2x4xf32>
    %159 = vector.extract_strided_slice %30 {offsets = [6, 0], sizes = [2, 32], strides = [1, 1]} : vector<16x32xf32> to vector<2x32xf32>
    %cst_54 = arith.constant dense<0.000000e+00> : vector<2x32xf32>
    %160 = tpu.matmul %140, %12, %cst_54 {dimension_numbers = #tpu.dot_dimension_numbers<[1], [0], [0], [1], [0, 0, 1, 1], [], []>} : vector<2x8xf32>, vector<8x32xf32>, vector<2x32xf32> -> vector<2x32xf32>
    %161 = arith.addf %159, %160 : vector<2x32xf32>
    %162 = arith.negf %161 : vector<2x32xf32>
    %163 = math.exp %162 : vector<2x32xf32>
    %cst_55 = arith.constant 1.000000e+00 : f32
    %164 = vector.broadcast %cst_55 : f32 to vector<2x32xf32>
    %165 = arith.addf %164, %163 : vector<2x32xf32>
    %166 = arith.divf %164, %165 : vector<2x32xf32>
    %167 = vector.extract_strided_slice %166 {offsets = [0, 0], sizes = [2, 8], strides = [1, 1]} : vector<2x32xf32> to vector<2x8xf32>
    %168 = vector.extract_strided_slice %166 {offsets = [0, 8], sizes = [2, 8], strides = [1, 1]} : vector<2x32xf32> to vector<2x8xf32>
    %169 = vector.extract_strided_slice %166 {offsets = [0, 24], sizes = [2, 8], strides = [1, 1]} : vector<2x32xf32> to vector<2x8xf32>
    %170 = vector.extract_strided_slice %161 {offsets = [0, 16], sizes = [2, 8], strides = [1, 1]} : vector<2x32xf32> to vector<2x8xf32>
    %171 = math.tanh %170 : vector<2x8xf32>
    %172 = arith.mulf %168, %138 : vector<2x8xf32>
    %173 = arith.mulf %167, %171 : vector<2x8xf32>
    %174 = arith.addf %172, %173 : vector<2x8xf32>
    %175 = math.tanh %174 : vector<2x8xf32>
    %176 = arith.mulf %169, %175 : vector<2x8xf32>
    %177 = vector.extract_strided_slice %25 {offsets = [8, 0], sizes = [2, 16], strides = [1, 1]} : vector<16x16xf32> to vector<2x16xf32>
    %cst_56 = arith.constant dense<0.000000e+00> : vector<2x16xf32>
    %178 = tpu.matmul %158, %4, %cst_56 {dimension_numbers = #tpu.dot_dimension_numbers<[1], [0], [0], [1], [0, 0, 1, 1], [], []>} : vector<2x4xf32>, vector<4x16xf32>, vector<2x16xf32> -> vector<2x16xf32>
    %179 = arith.addf %177, %178 : vector<2x16xf32>
    %180 = arith.negf %179 : vector<2x16xf32>
    %181 = math.exp %180 : vector<2x16xf32>
    %cst_57 = arith.constant 1.000000e+00 : f32
    %182 = vector.broadcast %cst_57 : f32 to vector<2x16xf32>
    %183 = arith.addf %182, %181 : vector<2x16xf32>
    %184 = arith.divf %182, %183 : vector<2x16xf32>
    %185 = vector.extract_strided_slice %184 {offsets = [0, 0], sizes = [2, 4], strides = [1, 1]} : vector<2x16xf32> to vector<2x4xf32>
    %186 = vector.extract_strided_slice %184 {offsets = [0, 4], sizes = [2, 4], strides = [1, 1]} : vector<2x16xf32> to vector<2x4xf32>
    %187 = vector.extract_strided_slice %184 {offsets = [0, 12], sizes = [2, 4], strides = [1, 1]} : vector<2x16xf32> to vector<2x4xf32>
    %188 = vector.extract_strided_slice %179 {offsets = [0, 8], sizes = [2, 4], strides = [1, 1]} : vector<2x16xf32> to vector<2x4xf32>
    %189 = math.tanh %188 : vector<2x4xf32>
    %190 = arith.mulf %186, %156 : vector<2x4xf32>
    %191 = arith.mulf %185, %189 : vector<2x4xf32>
    %192 = arith.addf %190, %191 : vector<2x4xf32>
    %193 = math.tanh %192 : vector<2x4xf32>
    %194 = arith.mulf %187, %193 : vector<2x4xf32>
    %195 = vector.extract_strided_slice %30 {offsets = [8, 0], sizes = [2, 32], strides = [1, 1]} : vector<16x32xf32> to vector<2x32xf32>
    %cst_58 = arith.constant dense<0.000000e+00> : vector<2x32xf32>
    %196 = tpu.matmul %176, %12, %cst_58 {dimension_numbers = #tpu.dot_dimension_numbers<[1], [0], [0], [1], [0, 0, 1, 1], [], []>} : vector<2x8xf32>, vector<8x32xf32>, vector<2x32xf32> -> vector<2x32xf32>
    %197 = arith.addf %195, %196 : vector<2x32xf32>
    %198 = arith.negf %197 : vector<2x32xf32>
    %199 = math.exp %198 : vector<2x32xf32>
    %cst_59 = arith.constant 1.000000e+00 : f32
    %200 = vector.broadcast %cst_59 : f32 to vector<2x32xf32>
    %201 = arith.addf %200, %199 : vector<2x32xf32>
    %202 = arith.divf %200, %201 : vector<2x32xf32>
    %203 = vector.extract_strided_slice %202 {offsets = [0, 0], sizes = [2, 8], strides = [1, 1]} : vector<2x32xf32> to vector<2x8xf32>
    %204 = vector.extract_strided_slice %202 {offsets = [0, 8], sizes = [2, 8], strides = [1, 1]} : vector<2x32xf32> to vector<2x8xf32>
    %205 = vector.extract_strided_slice %202 {offsets = [0, 24], sizes = [2, 8], strides = [1, 1]} : vector<2x32xf32> to vector<2x8xf32>
    %206 = vector.extract_strided_slice %197 {offsets = [0, 16], sizes = [2, 8], strides = [1, 1]} : vector<2x32xf32> to vector<2x8xf32>
    %207 = math.tanh %206 : vector<2x8xf32>
    %208 = arith.mulf %204, %174 : vector<2x8xf32>
    %209 = arith.mulf %203, %207 : vector<2x8xf32>
    %210 = arith.addf %208, %209 : vector<2x8xf32>
    %211 = math.tanh %210 : vector<2x8xf32>
    %212 = arith.mulf %205, %211 : vector<2x8xf32>
    %213 = vector.extract_strided_slice %25 {offsets = [10, 0], sizes = [2, 16], strides = [1, 1]} : vector<16x16xf32> to vector<2x16xf32>
    %cst_60 = arith.constant dense<0.000000e+00> : vector<2x16xf32>
    %214 = tpu.matmul %194, %4, %cst_60 {dimension_numbers = #tpu.dot_dimension_numbers<[1], [0], [0], [1], [0, 0, 1, 1], [], []>} : vector<2x4xf32>, vector<4x16xf32>, vector<2x16xf32> -> vector<2x16xf32>
    %215 = arith.addf %213, %214 : vector<2x16xf32>
    %216 = arith.negf %215 : vector<2x16xf32>
    %217 = math.exp %216 : vector<2x16xf32>
    %cst_61 = arith.constant 1.000000e+00 : f32
    %218 = vector.broadcast %cst_61 : f32 to vector<2x16xf32>
    %219 = arith.addf %218, %217 : vector<2x16xf32>
    %220 = arith.divf %218, %219 : vector<2x16xf32>
    %221 = vector.extract_strided_slice %220 {offsets = [0, 0], sizes = [2, 4], strides = [1, 1]} : vector<2x16xf32> to vector<2x4xf32>
    %222 = vector.extract_strided_slice %220 {offsets = [0, 4], sizes = [2, 4], strides = [1, 1]} : vector<2x16xf32> to vector<2x4xf32>
    %223 = vector.extract_strided_slice %220 {offsets = [0, 12], sizes = [2, 4], strides = [1, 1]} : vector<2x16xf32> to vector<2x4xf32>
    %224 = vector.extract_strided_slice %215 {offsets = [0, 8], sizes = [2, 4], strides = [1, 1]} : vector<2x16xf32> to vector<2x4xf32>
    %225 = math.tanh %224 : vector<2x4xf32>
    %226 = arith.mulf %222, %192 : vector<2x4xf32>
    %227 = arith.mulf %221, %225 : vector<2x4xf32>
    %228 = arith.addf %226, %227 : vector<2x4xf32>
    %229 = math.tanh %228 : vector<2x4xf32>
    %230 = arith.mulf %223, %229 : vector<2x4xf32>
    %231 = vector.extract_strided_slice %30 {offsets = [10, 0], sizes = [2, 32], strides = [1, 1]} : vector<16x32xf32> to vector<2x32xf32>
    %cst_62 = arith.constant dense<0.000000e+00> : vector<2x32xf32>
    %232 = tpu.matmul %212, %12, %cst_62 {dimension_numbers = #tpu.dot_dimension_numbers<[1], [0], [0], [1], [0, 0, 1, 1], [], []>} : vector<2x8xf32>, vector<8x32xf32>, vector<2x32xf32> -> vector<2x32xf32>
    %233 = arith.addf %231, %232 : vector<2x32xf32>
    %234 = arith.negf %233 : vector<2x32xf32>
    %235 = math.exp %234 : vector<2x32xf32>
    %cst_63 = arith.constant 1.000000e+00 : f32
    %236 = vector.broadcast %cst_63 : f32 to vector<2x32xf32>
    %237 = arith.addf %236, %235 : vector<2x32xf32>
    %238 = arith.divf %236, %237 : vector<2x32xf32>
    %239 = vector.extract_strided_slice %238 {offsets = [0, 0], sizes = [2, 8], strides = [1, 1]} : vector<2x32xf32> to vector<2x8xf32>
    %240 = vector.extract_strided_slice %238 {offsets = [0, 8], sizes = [2, 8], strides = [1, 1]} : vector<2x32xf32> to vector<2x8xf32>
    %241 = vector.extract_strided_slice %238 {offsets = [0, 24], sizes = [2, 8], strides = [1, 1]} : vector<2x32xf32> to vector<2x8xf32>
    %242 = vector.extract_strided_slice %233 {offsets = [0, 16], sizes = [2, 8], strides = [1, 1]} : vector<2x32xf32> to vector<2x8xf32>
    %243 = math.tanh %242 : vector<2x8xf32>
    %244 = arith.mulf %240, %210 : vector<2x8xf32>
    %245 = arith.mulf %239, %243 : vector<2x8xf32>
    %246 = arith.addf %244, %245 : vector<2x8xf32>
    %247 = math.tanh %246 : vector<2x8xf32>
    %248 = arith.mulf %241, %247 : vector<2x8xf32>
    %249 = vector.extract_strided_slice %25 {offsets = [12, 0], sizes = [2, 16], strides = [1, 1]} : vector<16x16xf32> to vector<2x16xf32>
    %cst_64 = arith.constant dense<0.000000e+00> : vector<2x16xf32>
    %250 = tpu.matmul %230, %4, %cst_64 {dimension_numbers = #tpu.dot_dimension_numbers<[1], [0], [0], [1], [0, 0, 1, 1], [], []>} : vector<2x4xf32>, vector<4x16xf32>, vector<2x16xf32> -> vector<2x16xf32>
    %251 = arith.addf %249, %250 : vector<2x16xf32>
    %252 = arith.negf %251 : vector<2x16xf32>
    %253 = math.exp %252 : vector<2x16xf32>
    %cst_65 = arith.constant 1.000000e+00 : f32
    %254 = vector.broadcast %cst_65 : f32 to vector<2x16xf32>
    %255 = arith.addf %254, %253 : vector<2x16xf32>
    %256 = arith.divf %254, %255 : vector<2x16xf32>
    %257 = vector.extract_strided_slice %256 {offsets = [0, 0], sizes = [2, 4], strides = [1, 1]} : vector<2x16xf32> to vector<2x4xf32>
    %258 = vector.extract_strided_slice %256 {offsets = [0, 4], sizes = [2, 4], strides = [1, 1]} : vector<2x16xf32> to vector<2x4xf32>
    %259 = vector.extract_strided_slice %256 {offsets = [0, 12], sizes = [2, 4], strides = [1, 1]} : vector<2x16xf32> to vector<2x4xf32>
    %260 = vector.extract_strided_slice %251 {offsets = [0, 8], sizes = [2, 4], strides = [1, 1]} : vector<2x16xf32> to vector<2x4xf32>
    %261 = math.tanh %260 : vector<2x4xf32>
    %262 = arith.mulf %258, %228 : vector<2x4xf32>
    %263 = arith.mulf %257, %261 : vector<2x4xf32>
    %264 = arith.addf %262, %263 : vector<2x4xf32>
    %265 = math.tanh %264 : vector<2x4xf32>
    %266 = arith.mulf %259, %265 : vector<2x4xf32>
    %267 = vector.extract_strided_slice %30 {offsets = [12, 0], sizes = [2, 32], strides = [1, 1]} : vector<16x32xf32> to vector<2x32xf32>
    %cst_66 = arith.constant dense<0.000000e+00> : vector<2x32xf32>
    %268 = tpu.matmul %248, %12, %cst_66 {dimension_numbers = #tpu.dot_dimension_numbers<[1], [0], [0], [1], [0, 0, 1, 1], [], []>} : vector<2x8xf32>, vector<8x32xf32>, vector<2x32xf32> -> vector<2x32xf32>
    %269 = arith.addf %267, %268 : vector<2x32xf32>
    %270 = arith.negf %269 : vector<2x32xf32>
    %271 = math.exp %270 : vector<2x32xf32>
    %cst_67 = arith.constant 1.000000e+00 : f32
    %272 = vector.broadcast %cst_67 : f32 to vector<2x32xf32>
    %273 = arith.addf %272, %271 : vector<2x32xf32>
    %274 = arith.divf %272, %273 : vector<2x32xf32>
    %275 = vector.extract_strided_slice %274 {offsets = [0, 0], sizes = [2, 8], strides = [1, 1]} : vector<2x32xf32> to vector<2x8xf32>
    %276 = vector.extract_strided_slice %274 {offsets = [0, 8], sizes = [2, 8], strides = [1, 1]} : vector<2x32xf32> to vector<2x8xf32>
    %277 = vector.extract_strided_slice %274 {offsets = [0, 24], sizes = [2, 8], strides = [1, 1]} : vector<2x32xf32> to vector<2x8xf32>
    %278 = vector.extract_strided_slice %269 {offsets = [0, 16], sizes = [2, 8], strides = [1, 1]} : vector<2x32xf32> to vector<2x8xf32>
    %279 = math.tanh %278 : vector<2x8xf32>
    %280 = arith.mulf %276, %246 : vector<2x8xf32>
    %281 = arith.mulf %275, %279 : vector<2x8xf32>
    %282 = arith.addf %280, %281 : vector<2x8xf32>
    %283 = math.tanh %282 : vector<2x8xf32>
    %284 = arith.mulf %277, %283 : vector<2x8xf32>
    %285 = vector.extract_strided_slice %25 {offsets = [14, 0], sizes = [2, 16], strides = [1, 1]} : vector<16x16xf32> to vector<2x16xf32>
    %cst_68 = arith.constant dense<0.000000e+00> : vector<2x16xf32>
    %286 = tpu.matmul %266, %4, %cst_68 {dimension_numbers = #tpu.dot_dimension_numbers<[1], [0], [0], [1], [0, 0, 1, 1], [], []>} : vector<2x4xf32>, vector<4x16xf32>, vector<2x16xf32> -> vector<2x16xf32>
    %287 = arith.addf %285, %286 : vector<2x16xf32>
    %288 = arith.negf %287 : vector<2x16xf32>
    %289 = math.exp %288 : vector<2x16xf32>
    %cst_69 = arith.constant 1.000000e+00 : f32
    %290 = vector.broadcast %cst_69 : f32 to vector<2x16xf32>
    %291 = arith.addf %290, %289 : vector<2x16xf32>
    %292 = arith.divf %290, %291 : vector<2x16xf32>
    %293 = vector.extract_strided_slice %292 {offsets = [0, 0], sizes = [2, 4], strides = [1, 1]} : vector<2x16xf32> to vector<2x4xf32>
    %294 = vector.extract_strided_slice %292 {offsets = [0, 4], sizes = [2, 4], strides = [1, 1]} : vector<2x16xf32> to vector<2x4xf32>
    %295 = vector.extract_strided_slice %292 {offsets = [0, 12], sizes = [2, 4], strides = [1, 1]} : vector<2x16xf32> to vector<2x4xf32>
    %296 = vector.extract_strided_slice %287 {offsets = [0, 8], sizes = [2, 4], strides = [1, 1]} : vector<2x16xf32> to vector<2x4xf32>
    %297 = math.tanh %296 : vector<2x4xf32>
    %298 = arith.mulf %294, %264 : vector<2x4xf32>
    %299 = arith.mulf %293, %297 : vector<2x4xf32>
    %300 = arith.addf %298, %299 : vector<2x4xf32>
    %301 = math.tanh %300 : vector<2x4xf32>
    %302 = arith.mulf %295, %301 : vector<2x4xf32>
    %303 = vector.extract_strided_slice %30 {offsets = [14, 0], sizes = [2, 32], strides = [1, 1]} : vector<16x32xf32> to vector<2x32xf32>
    %cst_70 = arith.constant dense<0.000000e+00> : vector<2x32xf32>
    %304 = tpu.matmul %284, %12, %cst_70 {dimension_numbers = #tpu.dot_dimension_numbers<[1], [0], [0], [1], [0, 0, 1, 1], [], []>} : vector<2x8xf32>, vector<8x32xf32>, vector<2x32xf32> -> vector<2x32xf32>
    %305 = arith.addf %303, %304 : vector<2x32xf32>
    %306 = arith.negf %305 : vector<2x32xf32>
    %307 = math.exp %306 : vector<2x32xf32>
    %cst_71 = arith.constant 1.000000e+00 : f32
    %308 = vector.broadcast %cst_71 : f32 to vector<2x32xf32>
    %309 = arith.addf %308, %307 : vector<2x32xf32>
    %310 = arith.divf %308, %309 : vector<2x32xf32>
    %311 = vector.extract_strided_slice %310 {offsets = [0, 0], sizes = [2, 8], strides = [1, 1]} : vector<2x32xf32> to vector<2x8xf32>
    %312 = vector.extract_strided_slice %310 {offsets = [0, 8], sizes = [2, 8], strides = [1, 1]} : vector<2x32xf32> to vector<2x8xf32>
    %313 = vector.extract_strided_slice %310 {offsets = [0, 24], sizes = [2, 8], strides = [1, 1]} : vector<2x32xf32> to vector<2x8xf32>
    %314 = vector.extract_strided_slice %305 {offsets = [0, 16], sizes = [2, 8], strides = [1, 1]} : vector<2x32xf32> to vector<2x8xf32>
    %315 = math.tanh %314 : vector<2x8xf32>
    %316 = arith.mulf %312, %282 : vector<2x8xf32>
    %317 = arith.mulf %311, %315 : vector<2x8xf32>
    %318 = arith.addf %316, %317 : vector<2x8xf32>
    %319 = math.tanh %318 : vector<2x8xf32>
    %320 = arith.mulf %313, %319 : vector<2x8xf32>
    %321 = tpu.concatenate %50, %86, %122, %158, %194, %230, %266, %302 in 0 : vector<2x4xf32>, vector<2x4xf32>, vector<2x4xf32>, vector<2x4xf32>, vector<2x4xf32>, vector<2x4xf32>, vector<2x4xf32>, vector<2x4xf32> -> vector<16x4xf32>
    %322 = tpu.concatenate %68, %104, %140, %176, %212, %248, %284, %320 in 0 : vector<2x8xf32>, vector<2x8xf32>, vector<2x8xf32>, vector<2x8xf32>, vector<2x8xf32>, vector<2x8xf32>, vector<2x8xf32>, vector<2x8xf32> -> vector<16x8xf32>
    %cst_72 = arith.constant dense<0.000000e+00> : vector<16x16xf32>
    %323 = tpu.matmul %321, %6, %cst_72 {dimension_numbers = #tpu.dot_dimension_numbers<[1], [0], [0], [1], [0, 0, 1, 1], [], []>} : vector<16x4xf32>, vector<4x16xf32>, vector<16x16xf32> -> vector<16x16xf32>
    %324 = vector.broadcast %8 : vector<1x16xf32> to vector<16x16xf32>
    %325 = arith.addf %323, %324 : vector<16x16xf32>
    %cst_73 = arith.constant 0.000000e+00 : f32
    %326 = vector.broadcast %cst_73 : f32 to vector<2x4xf32>
    %cst_74 = arith.constant 0.000000e+00 : f32
    %327 = vector.broadcast %cst_74 : f32 to vector<2x4xf32>
    %cst_75 = arith.constant dense<0.000000e+00> : vector<16x32xf32>
    %328 = tpu.matmul %322, %14, %cst_75 {dimension_numbers = #tpu.dot_dimension_numbers<[1], [0], [0], [1], [0, 0, 1, 1], [], []>} : vector<16x8xf32>, vector<8x32xf32>, vector<16x32xf32> -> vector<16x32xf32>
    %329 = vector.broadcast %16 : vector<1x32xf32> to vector<16x32xf32>
    %330 = arith.addf %328, %329 : vector<16x32xf32>
    %cst_76 = arith.constant 0.000000e+00 : f32
    %331 = vector.broadcast %cst_76 : f32 to vector<2x8xf32>
    %cst_77 = arith.constant 0.000000e+00 : f32
    %332 = vector.broadcast %cst_77 : f32 to vector<2x8xf32>
    %333 = vector.extract_strided_slice %325 {offsets = [0, 0], sizes = [2, 16], strides = [1, 1]} : vector<16x16xf32> to vector<2x16xf32>
    %cst_78 = arith.constant dense<0.000000e+00> : vector<2x16xf32>
    %334 = tpu.matmul %326, %7, %cst_78 {dimension_numbers = #tpu.dot_dimension_numbers<[1], [0], [0], [1], [0, 0, 1, 1], [], []>} : vector<2x4xf32>, vector<4x16xf32>, vector<2x16xf32> -> vector<2x16xf32>
    %335 = arith.addf %333, %334 : vector<2x16xf32>
    %336 = arith.negf %335 : vector<2x16xf32>
    %337 = math.exp %336 : vector<2x16xf32>
    %cst_79 = arith.constant 1.000000e+00 : f32
    %338 = vector.broadcast %cst_79 : f32 to vector<2x16xf32>
    %339 = arith.addf %338, %337 : vector<2x16xf32>
    %340 = arith.divf %338, %339 : vector<2x16xf32>
    %341 = vector.extract_strided_slice %340 {offsets = [0, 0], sizes = [2, 4], strides = [1, 1]} : vector<2x16xf32> to vector<2x4xf32>
    %342 = vector.extract_strided_slice %340 {offsets = [0, 4], sizes = [2, 4], strides = [1, 1]} : vector<2x16xf32> to vector<2x4xf32>
    %343 = vector.extract_strided_slice %340 {offsets = [0, 12], sizes = [2, 4], strides = [1, 1]} : vector<2x16xf32> to vector<2x4xf32>
    %344 = vector.extract_strided_slice %335 {offsets = [0, 8], sizes = [2, 4], strides = [1, 1]} : vector<2x16xf32> to vector<2x4xf32>
    %345 = math.tanh %344 : vector<2x4xf32>
    %346 = arith.mulf %342, %327 : vector<2x4xf32>
    %347 = arith.mulf %341, %345 : vector<2x4xf32>
    %348 = arith.addf %346, %347 : vector<2x4xf32>
    %349 = math.tanh %348 : vector<2x4xf32>
    %350 = arith.mulf %343, %349 : vector<2x4xf32>
    %351 = vector.extract_strided_slice %330 {offsets = [0, 0], sizes = [2, 32], strides = [1, 1]} : vector<16x32xf32> to vector<2x32xf32>
    %cst_80 = arith.constant dense<0.000000e+00> : vector<2x32xf32>
    %352 = tpu.matmul %331, %15, %cst_80 {dimension_numbers = #tpu.dot_dimension_numbers<[1], [0], [0], [1], [0, 0, 1, 1], [], []>} : vector<2x8xf32>, vector<8x32xf32>, vector<2x32xf32> -> vector<2x32xf32>
    %353 = arith.addf %351, %352 : vector<2x32xf32>
    %354 = arith.negf %353 : vector<2x32xf32>
    %355 = math.exp %354 : vector<2x32xf32>
    %cst_81 = arith.constant 1.000000e+00 : f32
    %356 = vector.broadcast %cst_81 : f32 to vector<2x32xf32>
    %357 = arith.addf %356, %355 : vector<2x32xf32>
    %358 = arith.divf %356, %357 : vector<2x32xf32>
    %359 = vector.extract_strided_slice %358 {offsets = [0, 0], sizes = [2, 8], strides = [1, 1]} : vector<2x32xf32> to vector<2x8xf32>
    %360 = vector.extract_strided_slice %358 {offsets = [0, 8], sizes = [2, 8], strides = [1, 1]} : vector<2x32xf32> to vector<2x8xf32>
    %361 = vector.extract_strided_slice %358 {offsets = [0, 24], sizes = [2, 8], strides = [1, 1]} : vector<2x32xf32> to vector<2x8xf32>
    %362 = vector.extract_strided_slice %353 {offsets = [0, 16], sizes = [2, 8], strides = [1, 1]} : vector<2x32xf32> to vector<2x8xf32>
    %363 = math.tanh %362 : vector<2x8xf32>
    %364 = arith.mulf %360, %332 : vector<2x8xf32>
    %365 = arith.mulf %359, %363 : vector<2x8xf32>
    %366 = arith.addf %364, %365 : vector<2x8xf32>
    %367 = math.tanh %366 : vector<2x8xf32>
    %368 = arith.mulf %361, %367 : vector<2x8xf32>
    %369 = vector.extract_strided_slice %325 {offsets = [2, 0], sizes = [2, 16], strides = [1, 1]} : vector<16x16xf32> to vector<2x16xf32>
    %cst_82 = arith.constant dense<0.000000e+00> : vector<2x16xf32>
    %370 = tpu.matmul %350, %7, %cst_82 {dimension_numbers = #tpu.dot_dimension_numbers<[1], [0], [0], [1], [0, 0, 1, 1], [], []>} : vector<2x4xf32>, vector<4x16xf32>, vector<2x16xf32> -> vector<2x16xf32>
    %371 = arith.addf %369, %370 : vector<2x16xf32>
    %372 = arith.negf %371 : vector<2x16xf32>
    %373 = math.exp %372 : vector<2x16xf32>
    %cst_83 = arith.constant 1.000000e+00 : f32
    %374 = vector.broadcast %cst_83 : f32 to vector<2x16xf32>
    %375 = arith.addf %374, %373 : vector<2x16xf32>
    %376 = arith.divf %374, %375 : vector<2x16xf32>
    %377 = vector.extract_strided_slice %376 {offsets = [0, 0], sizes = [2, 4], strides = [1, 1]} : vector<2x16xf32> to vector<2x4xf32>
    %378 = vector.extract_strided_slice %376 {offsets = [0, 4], sizes = [2, 4], strides = [1, 1]} : vector<2x16xf32> to vector<2x4xf32>
    %379 = vector.extract_strided_slice %376 {offsets = [0, 12], sizes = [2, 4], strides = [1, 1]} : vector<2x16xf32> to vector<2x4xf32>
    %380 = vector.extract_strided_slice %371 {offsets = [0, 8], sizes = [2, 4], strides = [1, 1]} : vector<2x16xf32> to vector<2x4xf32>
    %381 = math.tanh %380 : vector<2x4xf32>
    %382 = arith.mulf %378, %348 : vector<2x4xf32>
    %383 = arith.mulf %377, %381 : vector<2x4xf32>
    %384 = arith.addf %382, %383 : vector<2x4xf32>
    %385 = math.tanh %384 : vector<2x4xf32>
    %386 = arith.mulf %379, %385 : vector<2x4xf32>
    %387 = vector.extract_strided_slice %330 {offsets = [2, 0], sizes = [2, 32], strides = [1, 1]} : vector<16x32xf32> to vector<2x32xf32>
    %cst_84 = arith.constant dense<0.000000e+00> : vector<2x32xf32>
    %388 = tpu.matmul %368, %15, %cst_84 {dimension_numbers = #tpu.dot_dimension_numbers<[1], [0], [0], [1], [0, 0, 1, 1], [], []>} : vector<2x8xf32>, vector<8x32xf32>, vector<2x32xf32> -> vector<2x32xf32>
    %389 = arith.addf %387, %388 : vector<2x32xf32>
    %390 = arith.negf %389 : vector<2x32xf32>
    %391 = math.exp %390 : vector<2x32xf32>
    %cst_85 = arith.constant 1.000000e+00 : f32
    %392 = vector.broadcast %cst_85 : f32 to vector<2x32xf32>
    %393 = arith.addf %392, %391 : vector<2x32xf32>
    %394 = arith.divf %392, %393 : vector<2x32xf32>
    %395 = vector.extract_strided_slice %394 {offsets = [0, 0], sizes = [2, 8], strides = [1, 1]} : vector<2x32xf32> to vector<2x8xf32>
    %396 = vector.extract_strided_slice %394 {offsets = [0, 8], sizes = [2, 8], strides = [1, 1]} : vector<2x32xf32> to vector<2x8xf32>
    %397 = vector.extract_strided_slice %394 {offsets = [0, 24], sizes = [2, 8], strides = [1, 1]} : vector<2x32xf32> to vector<2x8xf32>
    %398 = vector.extract_strided_slice %389 {offsets = [0, 16], sizes = [2, 8], strides = [1, 1]} : vector<2x32xf32> to vector<2x8xf32>
    %399 = math.tanh %398 : vector<2x8xf32>
    %400 = arith.mulf %396, %366 : vector<2x8xf32>
    %401 = arith.mulf %395, %399 : vector<2x8xf32>
    %402 = arith.addf %400, %401 : vector<2x8xf32>
    %403 = math.tanh %402 : vector<2x8xf32>
    %404 = arith.mulf %397, %403 : vector<2x8xf32>
    %405 = vector.extract_strided_slice %325 {offsets = [4, 0], sizes = [2, 16], strides = [1, 1]} : vector<16x16xf32> to vector<2x16xf32>
    %cst_86 = arith.constant dense<0.000000e+00> : vector<2x16xf32>
    %406 = tpu.matmul %386, %7, %cst_86 {dimension_numbers = #tpu.dot_dimension_numbers<[1], [0], [0], [1], [0, 0, 1, 1], [], []>} : vector<2x4xf32>, vector<4x16xf32>, vector<2x16xf32> -> vector<2x16xf32>
    %407 = arith.addf %405, %406 : vector<2x16xf32>
    %408 = arith.negf %407 : vector<2x16xf32>
    %409 = math.exp %408 : vector<2x16xf32>
    %cst_87 = arith.constant 1.000000e+00 : f32
    %410 = vector.broadcast %cst_87 : f32 to vector<2x16xf32>
    %411 = arith.addf %410, %409 : vector<2x16xf32>
    %412 = arith.divf %410, %411 : vector<2x16xf32>
    %413 = vector.extract_strided_slice %412 {offsets = [0, 0], sizes = [2, 4], strides = [1, 1]} : vector<2x16xf32> to vector<2x4xf32>
    %414 = vector.extract_strided_slice %412 {offsets = [0, 4], sizes = [2, 4], strides = [1, 1]} : vector<2x16xf32> to vector<2x4xf32>
    %415 = vector.extract_strided_slice %412 {offsets = [0, 12], sizes = [2, 4], strides = [1, 1]} : vector<2x16xf32> to vector<2x4xf32>
    %416 = vector.extract_strided_slice %407 {offsets = [0, 8], sizes = [2, 4], strides = [1, 1]} : vector<2x16xf32> to vector<2x4xf32>
    %417 = math.tanh %416 : vector<2x4xf32>
    %418 = arith.mulf %414, %384 : vector<2x4xf32>
    %419 = arith.mulf %413, %417 : vector<2x4xf32>
    %420 = arith.addf %418, %419 : vector<2x4xf32>
    %421 = math.tanh %420 : vector<2x4xf32>
    %422 = arith.mulf %415, %421 : vector<2x4xf32>
    %423 = vector.extract_strided_slice %330 {offsets = [4, 0], sizes = [2, 32], strides = [1, 1]} : vector<16x32xf32> to vector<2x32xf32>
    %cst_88 = arith.constant dense<0.000000e+00> : vector<2x32xf32>
    %424 = tpu.matmul %404, %15, %cst_88 {dimension_numbers = #tpu.dot_dimension_numbers<[1], [0], [0], [1], [0, 0, 1, 1], [], []>} : vector<2x8xf32>, vector<8x32xf32>, vector<2x32xf32> -> vector<2x32xf32>
    %425 = arith.addf %423, %424 : vector<2x32xf32>
    %426 = arith.negf %425 : vector<2x32xf32>
    %427 = math.exp %426 : vector<2x32xf32>
    %cst_89 = arith.constant 1.000000e+00 : f32
    %428 = vector.broadcast %cst_89 : f32 to vector<2x32xf32>
    %429 = arith.addf %428, %427 : vector<2x32xf32>
    %430 = arith.divf %428, %429 : vector<2x32xf32>
    %431 = vector.extract_strided_slice %430 {offsets = [0, 0], sizes = [2, 8], strides = [1, 1]} : vector<2x32xf32> to vector<2x8xf32>
    %432 = vector.extract_strided_slice %430 {offsets = [0, 8], sizes = [2, 8], strides = [1, 1]} : vector<2x32xf32> to vector<2x8xf32>
    %433 = vector.extract_strided_slice %430 {offsets = [0, 24], sizes = [2, 8], strides = [1, 1]} : vector<2x32xf32> to vector<2x8xf32>
    %434 = vector.extract_strided_slice %425 {offsets = [0, 16], sizes = [2, 8], strides = [1, 1]} : vector<2x32xf32> to vector<2x8xf32>
    %435 = math.tanh %434 : vector<2x8xf32>
    %436 = arith.mulf %432, %402 : vector<2x8xf32>
    %437 = arith.mulf %431, %435 : vector<2x8xf32>
    %438 = arith.addf %436, %437 : vector<2x8xf32>
    %439 = math.tanh %438 : vector<2x8xf32>
    %440 = arith.mulf %433, %439 : vector<2x8xf32>
    %441 = vector.extract_strided_slice %325 {offsets = [6, 0], sizes = [2, 16], strides = [1, 1]} : vector<16x16xf32> to vector<2x16xf32>
    %cst_90 = arith.constant dense<0.000000e+00> : vector<2x16xf32>
    %442 = tpu.matmul %422, %7, %cst_90 {dimension_numbers = #tpu.dot_dimension_numbers<[1], [0], [0], [1], [0, 0, 1, 1], [], []>} : vector<2x4xf32>, vector<4x16xf32>, vector<2x16xf32> -> vector<2x16xf32>
    %443 = arith.addf %441, %442 : vector<2x16xf32>
    %444 = arith.negf %443 : vector<2x16xf32>
    %445 = math.exp %444 : vector<2x16xf32>
    %cst_91 = arith.constant 1.000000e+00 : f32
    %446 = vector.broadcast %cst_91 : f32 to vector<2x16xf32>
    %447 = arith.addf %446, %445 : vector<2x16xf32>
    %448 = arith.divf %446, %447 : vector<2x16xf32>
    %449 = vector.extract_strided_slice %448 {offsets = [0, 0], sizes = [2, 4], strides = [1, 1]} : vector<2x16xf32> to vector<2x4xf32>
    %450 = vector.extract_strided_slice %448 {offsets = [0, 4], sizes = [2, 4], strides = [1, 1]} : vector<2x16xf32> to vector<2x4xf32>
    %451 = vector.extract_strided_slice %448 {offsets = [0, 12], sizes = [2, 4], strides = [1, 1]} : vector<2x16xf32> to vector<2x4xf32>
    %452 = vector.extract_strided_slice %443 {offsets = [0, 8], sizes = [2, 4], strides = [1, 1]} : vector<2x16xf32> to vector<2x4xf32>
    %453 = math.tanh %452 : vector<2x4xf32>
    %454 = arith.mulf %450, %420 : vector<2x4xf32>
    %455 = arith.mulf %449, %453 : vector<2x4xf32>
    %456 = arith.addf %454, %455 : vector<2x4xf32>
    %457 = math.tanh %456 : vector<2x4xf32>
    %458 = arith.mulf %451, %457 : vector<2x4xf32>
    %459 = vector.extract_strided_slice %330 {offsets = [6, 0], sizes = [2, 32], strides = [1, 1]} : vector<16x32xf32> to vector<2x32xf32>
    %cst_92 = arith.constant dense<0.000000e+00> : vector<2x32xf32>
    %460 = tpu.matmul %440, %15, %cst_92 {dimension_numbers = #tpu.dot_dimension_numbers<[1], [0], [0], [1], [0, 0, 1, 1], [], []>} : vector<2x8xf32>, vector<8x32xf32>, vector<2x32xf32> -> vector<2x32xf32>
    %461 = arith.addf %459, %460 : vector<2x32xf32>
    %462 = arith.negf %461 : vector<2x32xf32>
    %463 = math.exp %462 : vector<2x32xf32>
    %cst_93 = arith.constant 1.000000e+00 : f32
    %464 = vector.broadcast %cst_93 : f32 to vector<2x32xf32>
    %465 = arith.addf %464, %463 : vector<2x32xf32>
    %466 = arith.divf %464, %465 : vector<2x32xf32>
    %467 = vector.extract_strided_slice %466 {offsets = [0, 0], sizes = [2, 8], strides = [1, 1]} : vector<2x32xf32> to vector<2x8xf32>
    %468 = vector.extract_strided_slice %466 {offsets = [0, 8], sizes = [2, 8], strides = [1, 1]} : vector<2x32xf32> to vector<2x8xf32>
    %469 = vector.extract_strided_slice %466 {offsets = [0, 24], sizes = [2, 8], strides = [1, 1]} : vector<2x32xf32> to vector<2x8xf32>
    %470 = vector.extract_strided_slice %461 {offsets = [0, 16], sizes = [2, 8], strides = [1, 1]} : vector<2x32xf32> to vector<2x8xf32>
    %471 = math.tanh %470 : vector<2x8xf32>
    %472 = arith.mulf %468, %438 : vector<2x8xf32>
    %473 = arith.mulf %467, %471 : vector<2x8xf32>
    %474 = arith.addf %472, %473 : vector<2x8xf32>
    %475 = math.tanh %474 : vector<2x8xf32>
    %476 = arith.mulf %469, %475 : vector<2x8xf32>
    %477 = vector.extract_strided_slice %325 {offsets = [8, 0], sizes = [2, 16], strides = [1, 1]} : vector<16x16xf32> to vector<2x16xf32>
    %cst_94 = arith.constant dense<0.000000e+00> : vector<2x16xf32>
    %478 = tpu.matmul %458, %7, %cst_94 {dimension_numbers = #tpu.dot_dimension_numbers<[1], [0], [0], [1], [0, 0, 1, 1], [], []>} : vector<2x4xf32>, vector<4x16xf32>, vector<2x16xf32> -> vector<2x16xf32>
    %479 = arith.addf %477, %478 : vector<2x16xf32>
    %480 = arith.negf %479 : vector<2x16xf32>
    %481 = math.exp %480 : vector<2x16xf32>
    %cst_95 = arith.constant 1.000000e+00 : f32
    %482 = vector.broadcast %cst_95 : f32 to vector<2x16xf32>
    %483 = arith.addf %482, %481 : vector<2x16xf32>
    %484 = arith.divf %482, %483 : vector<2x16xf32>
    %485 = vector.extract_strided_slice %484 {offsets = [0, 0], sizes = [2, 4], strides = [1, 1]} : vector<2x16xf32> to vector<2x4xf32>
    %486 = vector.extract_strided_slice %484 {offsets = [0, 4], sizes = [2, 4], strides = [1, 1]} : vector<2x16xf32> to vector<2x4xf32>
    %487 = vector.extract_strided_slice %484 {offsets = [0, 12], sizes = [2, 4], strides = [1, 1]} : vector<2x16xf32> to vector<2x4xf32>
    %488 = vector.extract_strided_slice %479 {offsets = [0, 8], sizes = [2, 4], strides = [1, 1]} : vector<2x16xf32> to vector<2x4xf32>
    %489 = math.tanh %488 : vector<2x4xf32>
    %490 = arith.mulf %486, %456 : vector<2x4xf32>
    %491 = arith.mulf %485, %489 : vector<2x4xf32>
    %492 = arith.addf %490, %491 : vector<2x4xf32>
    %493 = math.tanh %492 : vector<2x4xf32>
    %494 = arith.mulf %487, %493 : vector<2x4xf32>
    %495 = vector.extract_strided_slice %330 {offsets = [8, 0], sizes = [2, 32], strides = [1, 1]} : vector<16x32xf32> to vector<2x32xf32>
    %cst_96 = arith.constant dense<0.000000e+00> : vector<2x32xf32>
    %496 = tpu.matmul %476, %15, %cst_96 {dimension_numbers = #tpu.dot_dimension_numbers<[1], [0], [0], [1], [0, 0, 1, 1], [], []>} : vector<2x8xf32>, vector<8x32xf32>, vector<2x32xf32> -> vector<2x32xf32>
    %497 = arith.addf %495, %496 : vector<2x32xf32>
    %498 = arith.negf %497 : vector<2x32xf32>
    %499 = math.exp %498 : vector<2x32xf32>
    %cst_97 = arith.constant 1.000000e+00 : f32
    %500 = vector.broadcast %cst_97 : f32 to vector<2x32xf32>
    %501 = arith.addf %500, %499 : vector<2x32xf32>
    %502 = arith.divf %500, %501 : vector<2x32xf32>
    %503 = vector.extract_strided_slice %502 {offsets = [0, 0], sizes = [2, 8], strides = [1, 1]} : vector<2x32xf32> to vector<2x8xf32>
    %504 = vector.extract_strided_slice %502 {offsets = [0, 8], sizes = [2, 8], strides = [1, 1]} : vector<2x32xf32> to vector<2x8xf32>
    %505 = vector.extract_strided_slice %502 {offsets = [0, 24], sizes = [2, 8], strides = [1, 1]} : vector<2x32xf32> to vector<2x8xf32>
    %506 = vector.extract_strided_slice %497 {offsets = [0, 16], sizes = [2, 8], strides = [1, 1]} : vector<2x32xf32> to vector<2x8xf32>
    %507 = math.tanh %506 : vector<2x8xf32>
    %508 = arith.mulf %504, %474 : vector<2x8xf32>
    %509 = arith.mulf %503, %507 : vector<2x8xf32>
    %510 = arith.addf %508, %509 : vector<2x8xf32>
    %511 = math.tanh %510 : vector<2x8xf32>
    %512 = arith.mulf %505, %511 : vector<2x8xf32>
    %513 = vector.extract_strided_slice %325 {offsets = [10, 0], sizes = [2, 16], strides = [1, 1]} : vector<16x16xf32> to vector<2x16xf32>
    %cst_98 = arith.constant dense<0.000000e+00> : vector<2x16xf32>
    %514 = tpu.matmul %494, %7, %cst_98 {dimension_numbers = #tpu.dot_dimension_numbers<[1], [0], [0], [1], [0, 0, 1, 1], [], []>} : vector<2x4xf32>, vector<4x16xf32>, vector<2x16xf32> -> vector<2x16xf32>
    %515 = arith.addf %513, %514 : vector<2x16xf32>
    %516 = arith.negf %515 : vector<2x16xf32>
    %517 = math.exp %516 : vector<2x16xf32>
    %cst_99 = arith.constant 1.000000e+00 : f32
    %518 = vector.broadcast %cst_99 : f32 to vector<2x16xf32>
    %519 = arith.addf %518, %517 : vector<2x16xf32>
    %520 = arith.divf %518, %519 : vector<2x16xf32>
    %521 = vector.extract_strided_slice %520 {offsets = [0, 0], sizes = [2, 4], strides = [1, 1]} : vector<2x16xf32> to vector<2x4xf32>
    %522 = vector.extract_strided_slice %520 {offsets = [0, 4], sizes = [2, 4], strides = [1, 1]} : vector<2x16xf32> to vector<2x4xf32>
    %523 = vector.extract_strided_slice %520 {offsets = [0, 12], sizes = [2, 4], strides = [1, 1]} : vector<2x16xf32> to vector<2x4xf32>
    %524 = vector.extract_strided_slice %515 {offsets = [0, 8], sizes = [2, 4], strides = [1, 1]} : vector<2x16xf32> to vector<2x4xf32>
    %525 = math.tanh %524 : vector<2x4xf32>
    %526 = arith.mulf %522, %492 : vector<2x4xf32>
    %527 = arith.mulf %521, %525 : vector<2x4xf32>
    %528 = arith.addf %526, %527 : vector<2x4xf32>
    %529 = math.tanh %528 : vector<2x4xf32>
    %530 = arith.mulf %523, %529 : vector<2x4xf32>
    %531 = vector.extract_strided_slice %330 {offsets = [10, 0], sizes = [2, 32], strides = [1, 1]} : vector<16x32xf32> to vector<2x32xf32>
    %cst_100 = arith.constant dense<0.000000e+00> : vector<2x32xf32>
    %532 = tpu.matmul %512, %15, %cst_100 {dimension_numbers = #tpu.dot_dimension_numbers<[1], [0], [0], [1], [0, 0, 1, 1], [], []>} : vector<2x8xf32>, vector<8x32xf32>, vector<2x32xf32> -> vector<2x32xf32>
    %533 = arith.addf %531, %532 : vector<2x32xf32>
    %534 = arith.negf %533 : vector<2x32xf32>
    %535 = math.exp %534 : vector<2x32xf32>
    %cst_101 = arith.constant 1.000000e+00 : f32
    %536 = vector.broadcast %cst_101 : f32 to vector<2x32xf32>
    %537 = arith.addf %536, %535 : vector<2x32xf32>
    %538 = arith.divf %536, %537 : vector<2x32xf32>
    %539 = vector.extract_strided_slice %538 {offsets = [0, 0], sizes = [2, 8], strides = [1, 1]} : vector<2x32xf32> to vector<2x8xf32>
    %540 = vector.extract_strided_slice %538 {offsets = [0, 8], sizes = [2, 8], strides = [1, 1]} : vector<2x32xf32> to vector<2x8xf32>
    %541 = vector.extract_strided_slice %538 {offsets = [0, 24], sizes = [2, 8], strides = [1, 1]} : vector<2x32xf32> to vector<2x8xf32>
    %542 = vector.extract_strided_slice %533 {offsets = [0, 16], sizes = [2, 8], strides = [1, 1]} : vector<2x32xf32> to vector<2x8xf32>
    %543 = math.tanh %542 : vector<2x8xf32>
    %544 = arith.mulf %540, %510 : vector<2x8xf32>
    %545 = arith.mulf %539, %543 : vector<2x8xf32>
    %546 = arith.addf %544, %545 : vector<2x8xf32>
    %547 = math.tanh %546 : vector<2x8xf32>
    %548 = arith.mulf %541, %547 : vector<2x8xf32>
    %549 = vector.extract_strided_slice %325 {offsets = [12, 0], sizes = [2, 16], strides = [1, 1]} : vector<16x16xf32> to vector<2x16xf32>
    %cst_102 = arith.constant dense<0.000000e+00> : vector<2x16xf32>
    %550 = tpu.matmul %530, %7, %cst_102 {dimension_numbers = #tpu.dot_dimension_numbers<[1], [0], [0], [1], [0, 0, 1, 1], [], []>} : vector<2x4xf32>, vector<4x16xf32>, vector<2x16xf32> -> vector<2x16xf32>
    %551 = arith.addf %549, %550 : vector<2x16xf32>
    %552 = arith.negf %551 : vector<2x16xf32>
    %553 = math.exp %552 : vector<2x16xf32>
    %cst_103 = arith.constant 1.000000e+00 : f32
    %554 = vector.broadcast %cst_103 : f32 to vector<2x16xf32>
    %555 = arith.addf %554, %553 : vector<2x16xf32>
    %556 = arith.divf %554, %555 : vector<2x16xf32>
    %557 = vector.extract_strided_slice %556 {offsets = [0, 0], sizes = [2, 4], strides = [1, 1]} : vector<2x16xf32> to vector<2x4xf32>
    %558 = vector.extract_strided_slice %556 {offsets = [0, 4], sizes = [2, 4], strides = [1, 1]} : vector<2x16xf32> to vector<2x4xf32>
    %559 = vector.extract_strided_slice %556 {offsets = [0, 12], sizes = [2, 4], strides = [1, 1]} : vector<2x16xf32> to vector<2x4xf32>
    %560 = vector.extract_strided_slice %551 {offsets = [0, 8], sizes = [2, 4], strides = [1, 1]} : vector<2x16xf32> to vector<2x4xf32>
    %561 = math.tanh %560 : vector<2x4xf32>
    %562 = arith.mulf %558, %528 : vector<2x4xf32>
    %563 = arith.mulf %557, %561 : vector<2x4xf32>
    %564 = arith.addf %562, %563 : vector<2x4xf32>
    %565 = math.tanh %564 : vector<2x4xf32>
    %566 = arith.mulf %559, %565 : vector<2x4xf32>
    %567 = vector.extract_strided_slice %330 {offsets = [12, 0], sizes = [2, 32], strides = [1, 1]} : vector<16x32xf32> to vector<2x32xf32>
    %cst_104 = arith.constant dense<0.000000e+00> : vector<2x32xf32>
    %568 = tpu.matmul %548, %15, %cst_104 {dimension_numbers = #tpu.dot_dimension_numbers<[1], [0], [0], [1], [0, 0, 1, 1], [], []>} : vector<2x8xf32>, vector<8x32xf32>, vector<2x32xf32> -> vector<2x32xf32>
    %569 = arith.addf %567, %568 : vector<2x32xf32>
    %570 = arith.negf %569 : vector<2x32xf32>
    %571 = math.exp %570 : vector<2x32xf32>
    %cst_105 = arith.constant 1.000000e+00 : f32
    %572 = vector.broadcast %cst_105 : f32 to vector<2x32xf32>
    %573 = arith.addf %572, %571 : vector<2x32xf32>
    %574 = arith.divf %572, %573 : vector<2x32xf32>
    %575 = vector.extract_strided_slice %574 {offsets = [0, 0], sizes = [2, 8], strides = [1, 1]} : vector<2x32xf32> to vector<2x8xf32>
    %576 = vector.extract_strided_slice %574 {offsets = [0, 8], sizes = [2, 8], strides = [1, 1]} : vector<2x32xf32> to vector<2x8xf32>
    %577 = vector.extract_strided_slice %574 {offsets = [0, 24], sizes = [2, 8], strides = [1, 1]} : vector<2x32xf32> to vector<2x8xf32>
    %578 = vector.extract_strided_slice %569 {offsets = [0, 16], sizes = [2, 8], strides = [1, 1]} : vector<2x32xf32> to vector<2x8xf32>
    %579 = math.tanh %578 : vector<2x8xf32>
    %580 = arith.mulf %576, %546 : vector<2x8xf32>
    %581 = arith.mulf %575, %579 : vector<2x8xf32>
    %582 = arith.addf %580, %581 : vector<2x8xf32>
    %583 = math.tanh %582 : vector<2x8xf32>
    %584 = arith.mulf %577, %583 : vector<2x8xf32>
    %585 = vector.extract_strided_slice %325 {offsets = [14, 0], sizes = [2, 16], strides = [1, 1]} : vector<16x16xf32> to vector<2x16xf32>
    %cst_106 = arith.constant dense<0.000000e+00> : vector<2x16xf32>
    %586 = tpu.matmul %566, %7, %cst_106 {dimension_numbers = #tpu.dot_dimension_numbers<[1], [0], [0], [1], [0, 0, 1, 1], [], []>} : vector<2x4xf32>, vector<4x16xf32>, vector<2x16xf32> -> vector<2x16xf32>
    %587 = arith.addf %585, %586 : vector<2x16xf32>
    %588 = arith.negf %587 : vector<2x16xf32>
    %589 = math.exp %588 : vector<2x16xf32>
    %cst_107 = arith.constant 1.000000e+00 : f32
    %590 = vector.broadcast %cst_107 : f32 to vector<2x16xf32>
    %591 = arith.addf %590, %589 : vector<2x16xf32>
    %592 = arith.divf %590, %591 : vector<2x16xf32>
    %593 = vector.extract_strided_slice %592 {offsets = [0, 0], sizes = [2, 4], strides = [1, 1]} : vector<2x16xf32> to vector<2x4xf32>
    %594 = vector.extract_strided_slice %592 {offsets = [0, 4], sizes = [2, 4], strides = [1, 1]} : vector<2x16xf32> to vector<2x4xf32>
    %595 = vector.extract_strided_slice %592 {offsets = [0, 12], sizes = [2, 4], strides = [1, 1]} : vector<2x16xf32> to vector<2x4xf32>
    %596 = vector.extract_strided_slice %587 {offsets = [0, 8], sizes = [2, 4], strides = [1, 1]} : vector<2x16xf32> to vector<2x4xf32>
    %597 = math.tanh %596 : vector<2x4xf32>
    %598 = arith.mulf %594, %564 : vector<2x4xf32>
    %599 = arith.mulf %593, %597 : vector<2x4xf32>
    %600 = arith.addf %598, %599 : vector<2x4xf32>
    %601 = math.tanh %600 : vector<2x4xf32>
    %602 = arith.mulf %595, %601 : vector<2x4xf32>
    %603 = vector.extract_strided_slice %330 {offsets = [14, 0], sizes = [2, 32], strides = [1, 1]} : vector<16x32xf32> to vector<2x32xf32>
    %cst_108 = arith.constant dense<0.000000e+00> : vector<2x32xf32>
    %604 = tpu.matmul %584, %15, %cst_108 {dimension_numbers = #tpu.dot_dimension_numbers<[1], [0], [0], [1], [0, 0, 1, 1], [], []>} : vector<2x8xf32>, vector<8x32xf32>, vector<2x32xf32> -> vector<2x32xf32>
    %605 = arith.addf %603, %604 : vector<2x32xf32>
    %606 = arith.negf %605 : vector<2x32xf32>
    %607 = math.exp %606 : vector<2x32xf32>
    %cst_109 = arith.constant 1.000000e+00 : f32
    %608 = vector.broadcast %cst_109 : f32 to vector<2x32xf32>
    %609 = arith.addf %608, %607 : vector<2x32xf32>
    %610 = arith.divf %608, %609 : vector<2x32xf32>
    %611 = vector.extract_strided_slice %610 {offsets = [0, 0], sizes = [2, 8], strides = [1, 1]} : vector<2x32xf32> to vector<2x8xf32>
    %612 = vector.extract_strided_slice %610 {offsets = [0, 8], sizes = [2, 8], strides = [1, 1]} : vector<2x32xf32> to vector<2x8xf32>
    %613 = vector.extract_strided_slice %610 {offsets = [0, 24], sizes = [2, 8], strides = [1, 1]} : vector<2x32xf32> to vector<2x8xf32>
    %614 = vector.extract_strided_slice %605 {offsets = [0, 16], sizes = [2, 8], strides = [1, 1]} : vector<2x32xf32> to vector<2x8xf32>
    %615 = math.tanh %614 : vector<2x8xf32>
    %616 = arith.mulf %612, %582 : vector<2x8xf32>
    %617 = arith.mulf %611, %615 : vector<2x8xf32>
    %618 = arith.addf %616, %617 : vector<2x8xf32>
    %619 = math.tanh %618 : vector<2x8xf32>
    %620 = arith.mulf %613, %619 : vector<2x8xf32>
    %621 = tpu.concatenate %350, %386, %422, %458, %494, %530, %566, %602 in 0 : vector<2x4xf32>, vector<2x4xf32>, vector<2x4xf32>, vector<2x4xf32>, vector<2x4xf32>, vector<2x4xf32>, vector<2x4xf32>, vector<2x4xf32> -> vector<16x4xf32>
    %622 = tpu.concatenate %368, %404, %440, %476, %512, %548, %584, %620 in 0 : vector<2x8xf32>, vector<2x8xf32>, vector<2x8xf32>, vector<2x8xf32>, vector<2x8xf32>, vector<2x8xf32>, vector<2x8xf32>, vector<2x8xf32> -> vector<16x8xf32>
    %c0_110 = arith.constant 0 : index
    %c0_111 = arith.constant 0 : index
    %623 = vector.load %arg17[%c0_110, %c0_111] : memref<16x4xf32, #tpu.memory_space<vmem>>, vector<16x4xf32>
    tpu.vector_store %arg17[%c0_110, %c0_111], %621 {strides = array<i32>} : memref<16x4xf32, #tpu.memory_space<vmem>>, vector<16x4xf32>,
    %c0_112 = arith.constant 0 : index
    %c0_113 = arith.constant 0 : index
    %624 = vector.load %arg18[%c0_112, %c0_113] : memref<16x8xf32, #tpu.memory_space<vmem>>, vector<16x8xf32>
    tpu.vector_store %arg18[%c0_112, %c0_113], %622 {strides = array<i32>} : memref<16x8xf32, #tpu.memory_space<vmem>>, vector<16x8xf32>,
    return
  }
}

</mosaic_0001>

<bundles_post_ra>
// kernel: tpu_custom_call.1
= control target key start
LH: loop header
LB: loop body
LE: loop exit
PB: predicated region body
PF: predicated region fallthrough
CT: control target
= control target key end

     0   :  { %s5482_s0 = inlined_call_operand.vmem [shape: f32[16,8], index: 0, kind: input, shape index: {}]   ;;  %s5483_s1 = inlined_call_operand.vmem [shape: f32[8,32], index: 1, kind: input, shape index: {}]   ;;  %s5484_s2 = inlined_call_operand.vmem [shape: f32[1,32], index: 2, kind: input, shape index: {}]   ;;  %s5485_s3 = inlined_call_operand.vmem [shape: f32[32,16], index: 3, kind: input, shape index: {}]   ;;  %s5486_s4 = inlined_call_operand.hbm [shape: f32[4,16], index: 4, kind: input, shape index: {}]   ;;  %s5487_s5 = inlined_call_operand.vmem [shape: f32[1,16], index: 5, kind: input, shape index: {}]   ;;  %s5488_s6 = inlined_call_operand.vmem [shape: f32[4,16], index: 6, kind: input, shape index: {}]   ;;  %s5489_s7 = inlined_call_operand.vmem [shape: f32[4,16], index: 7, kind: input, shape index: {}]   ;;  %s5490_s8 = inlined_call_operand.vmem [shape: f32[1,16], index: 8, kind: input, shape index: {}]   ;;  %s5491_s9 = inlined_call_operand.vmem [shape: f32[8,32], index: 9, kind: input, shape index: {}]   ;;  %s5492_s10 = inlined_call_operand.vmem [shape: f32[1,32], index: 10, kind: input, shape index: {}]   ;;  %s5493_s11 = inlined_call_operand.vmem [shape: f32[32,32], index: 11, kind: input, shape index: {}]   ;;  %s5494_s12 = inlined_call_operand.vmem [shape: f32[8,32], index: 12, kind: input, shape index: {}]   ;;  %s5495_s13 = inlined_call_operand.vmem [shape: f32[1,32], index: 13, kind: input, shape index: {}]   ;;  %s5496_s14 = inlined_call_operand.vmem [shape: f32[8,32], index: 14, kind: input, shape index: {}]   ;;  %s5497_s15 = inlined_call_operand.vmem [shape: f32[8,32], index: 15, kind: input, shape index: {}]   ;;  %s5498_s16 = inlined_call_operand.vmem [shape: f32[1,32], index: 16, kind: input, shape index: {}]   ;;  %s5499_s17 = inlined_call_operand.vmem [shape: f32[16,4], index: 17, kind: output, shape index: {0}]   ;;  %s5500_s18 = inlined_call_operand.vmem [shape: f32[16,8], index: 18, kind: output, shape index: {1}]  }
   0x1   :  { %5502 = sst [smem:[#allocation5_spill]] %s5482_s0 }
   0x2   :  { %5503 = sst [smem:[#allocation6_spill]] %s5483_s1 }
   0x3   :  { %5504 = sst [smem:[#allocation7_spill]] %s5484_s2 }
   0x4   :  { %24 = vsyncpa [#allocation3], 0  ;;  %s4738_s27 = smov [#allocation2]   ;;  %s4714_s0 = scalar_lea.hbm %s5486_s4, 64 }
   0x5   :  { %s39_s28 = sshll.u32 %s4738_s27, 4  ;;  %p4715_p0 = scmp.ne.s32.totalorder %s5486_s4, %s4714_s0  ;;  %s40_s28 = int_to_ptr.vmem [resolvable:$true] %s39_s28 }
   0x6   :  { %p4718_p1 = scmp.lt.u32.totalorder %s4714_s0, %s5486_s4 }
   0x8   :  { %p4720_p2 = pnand %p4718_p1, %p4715_p0 }
   0xa   :  { %4723 = shalt.err (!%p4720_p2)
}
   0xb   :  { %s4724_s22 = scalar_lea.vmem %s40_s28, 64  ;;  %p4729_p4 = scmp.lt.s32.totalorder %s40_s28, %s40_s28 }
   0xc   :  { %p4725_p3 = scmp.ne.s32.totalorder %s40_s28, %s4724_s22  ;;  %p4730_p5 = scmp.lt.s32.totalorder %s4724_s22, %s4724_s22 }
   0xe   :  { %p4731_p6 = por %p4730_p5, %p4729_p4 }
  0x10   :  { %p4732_p7 = pnand %p4731_p6, %p4725_p3 }
  0x12   :  { %4735 = shalt.err (!%p4732_p7)
}
  0x13   :  { %42 = dma.hbm_to_vmem [thread:$0]  %s5486_s4, 64, %s40_s28, [#allocation3]  }
  0x14   :  { %4736 = dma.done.wait [#allocation3], 64  }
  0x15   :  { %4737 = vsyncadd [#allocation3], 4294967232  ;;  %vm100_vm0 = vcmask 64512   ;;  %s5505_s26 = sld [smem:[#allocation6_spill]]  ;;  %v83_v1 = vld [vmem:[%s5491_s9] sm:$0xff]  ;;  %s5506_s19 = sld [smem:[#allocation5_spill]] }
  0x16   :  { %4235 = vmatprep.subr.mxu1 %v83_v1  ;;  %v74_v4 = vld [vmem:[%s5485_s3] sm:$0xff]  ;;  %v75_v5 = vld [vmem:[%s5485_s3 + $0x8] sm:$0xff]  ;;  %v76_v10 = vld [vmem:[%s5485_s3 + $0x10] sm:$0xff]  ;;  %v4739_v16 = vmov 0.0   ;;  %s5507_s21 = sld [smem:[#allocation7_spill]]  ;;  %vm269_vm1 = vcmask 261120  }
  0x17   :  { %v4432_v6 = vpack.c.bf16 %v75_v5, %v74_v4  ;;  %v85_v7 = vld [vmem:[%s5493_s11] sm:$0xff]  ;;  %v86_v8 = vld [vmem:[%s5493_s11 + $0x8] sm:$0xff]  ;;  %4236 = vmatpush3.msra.mxu1 %v83_v1  ;;  %v77_v11 = vld [vmem:[%s5485_s3 + $0x18] sm:$0xff]  ;;  %vm442_vm2 = vcmask 1043456   ;;  %vm4740_vm3 = vmmov 0   ;;  %s4743_s23 = smov 4  }
  0x18   :  { %v4440_v9 = vpack.c.bf16 %v86_v8, %v85_v7  ;;  %v87_v12 = vld [vmem:[%s5493_s11 + $0x10] sm:$0xff]  ;;  %v4436_v13 = vpack.c.bf16 %v77_v11, %v76_v10  ;;  %v88_v14 = vld [vmem:[%s5493_s11 + $0x18] sm:$0xff]  ;;  %v4050_v17 = vld [vmem:[%s5492_s10] ss:$0 sm:$0xff]  ;;  %s4744_s24 = smov 8   ;;  %s4745_s25 = smov 16  }
  0x19   :  { %v4444_v15 = vpack.c.bf16 %v88_v14, %v87_v12  ;;  %v4903_v27 = vld [vmem:[#allocation2] sm:$0xf]  ;;  %s4747_s27 = smov 104   ;;  %vm438_vm4 = vcmask 31744   ;;  %vm2126_vm5 = vcmask 1041408   ;;  %vm2129_vm6 = vcmask 1045504  }
  0x1a   :  { %4441 = vmatprep.subr.bf16.mxu1 %v4440_v9  ;;  %v4908_v28 = vld [vmem:[%s5494_s12] sm:$0xff] }
  0x1b   :  { %v72_v0 = vld [vmem:[%s5505_s26] sm:$0xff]  ;;  %v71_v3 = vld [vmem:[%s5506_s19 + $0x8] sm:$0xff]  ;;  %s4746_s26 = smov 116  }
  0x1c   :  { %v70_v2 = vld [vmem:[%s5506_s19] sm:$0xff]  ;;  %4230 = vmatprep.subr.mxu0 %v72_v0 }
  0x1d   :  { %4231 = vmatpush3.msra.mxu0 %v72_v0  ;;  %4232 = vmatprep.mubr.msk.f32.mxu0 %vm100_vm0, %v70_v2  ;;  %v4047_v18 = vld [vmem:[%s5507_s21] ss:$0 sm:$0xff] }
  0x1e   :  { %4237 = vmatprep.mubr.msk.f32.mxu1 %vm100_vm0, %v70_v2  ;;  %4233 = vmatmul.mubr.msk.f32.vlgmr.msra.gmra.mrb[0].mxu0 %vm100_vm0, %v71_v3  ;;  %v4053_v29 = vld [vmem:[%s5487_s5] ss:$0 sm:$0xff]  ;;  %s4741_s5 = smov 120  }
  0x1f   :  { %4238 = vmatmul.mubr.msk.f32.vlgmr.msra.gmra.mrb[0].mxu1 %vm100_vm0, %v71_v3  ;;  %4433 = vmatprep.subr.bf16.mxu0 %v4432_v6  ;;  %v4056_v30 = vld [vmem:[%s5495_s13] ss:$0 sm:$0xff]  ;;  %s4742_s13 = smov 112  }
  0x20   :  { %4435 = vmatpush3.bf16.msra.mxu0 %v4432_v6  ;;  %4443 = vmatpush3.bf16.msra.mxu1 %v4440_v9 }
  0x21   :  { %4437 = vmatprep.subr.bf16.mxu0 %v4436_v13  ;;  %4445 = vmatprep.subr.bf16.mxu1 %v4444_v15 }
  0x24   :  { %4439 = vmatpush3.bf16.msra.mxu0 %v4436_v13  ;;  %4447 = vmatpush3.bf16.msra.mxu1 %v4444_v15 }
  0x25   :  { %4262 = vmatprep.subr.mxu0 %v4739_v16  ;;  %4267 = vmatprep.subr.mxu1 %v4739_v16 }
  0xf1   :  { %v4234_v19 = vpop.f32.mrb[0].mxu0 }
  0xf2   :  { %v4239_v20 = vpop.f32.mrb[0].mxu1  ;;  %v173_v22 = vpop.f32.mrb[1].mxu0  ;;  %v179_v26 = vadd.f32 %v4234_v19, %v4047_v18 }
  0xf3   :  { %v260_v21 = vadd.f32 %v4239_v20, %v4050_v17  ;;  %v254_v23 = vpop.f32.mrb[1].mxu1  ;;  %v174_v24 = vadd.f32 %v4047_v18, %v173_v22 }
  0xf4   :  { %v255_v25 = vadd.f32 %v4050_v17, %v254_v23 }
  0xf5   :  { %4248 = vmatprep.mubr.msk.f32.mxu0 %vm269_vm1, %v174_v24 }
  0xf6   :  { %4259 = vmatprep.mubr.msk.f32.mxu1 %vm269_vm1, %v255_v25  ;;  %4249 = vmatmul.mubr.msk.f32.vlgmr.msra.gmra.mrb[2].mxu0 %vm269_vm1, %v179_v26 }
  0xf7   :  { %4260 = vmatmul.mubr.msk.f32.vlgmr.msra.gmra.mrb[2].mxu1 %vm269_vm1, %v260_v21  ;;  %4263 = vmatpush3.msk.msra.mxu0 %vm442_vm2, %v4903_v27 }
  0xf8   :  { %4264 = vmatprep.mubr.msk.f32.mxu0 %vm4740_vm3, %v4739_v16  ;;  %4268 = vmatpush3.msra.mxu1 %v4908_v28 }
  0xf9   :  { %4269 = vmatprep.mubr.msk.f32.mxu1 %vm4740_vm3, %v4739_v16  ;;  %4272 = vmatprep.subr.mxu0 %v4739_v16 }
  0xfa   :  { %4277 = vmatprep.subr.mxu1 %v4739_v16  ;;  %4265 = vmatmul.mubr.f32.vlgmr.msra.gmra.mrb[4].mxu0 %v4739_v16 }
  0xfb   :  { %4270 = vmatmul.mubr.f32.vlgmr.msra.gmra.mrb[4].mxu1 %v4739_v16  ;;  %4273 = vmatpush3.msk.msra.mxu0 %vm442_vm2, %v4903_v27 }
  0xfc   :  { %4274 = vmatprep.mubr.msk.f32.mxu0 %vm4740_vm3, %v4739_v16  ;;  %4278 = vmatpush3.msra.mxu1 %v4908_v28 }
  0xfd   :  { %4279 = vmatprep.mubr.msk.f32.mxu1 %vm4740_vm3, %v4739_v16  ;;  %4282 = vmatprep.subr.mxu0 %v4739_v16 }
  0xfe   :  { %4287 = vmatprep.subr.mxu1 %v4739_v16 }
 0x1c9   :  { %v4250_v31 = vpop.f32.mrb[2].mxu0 }
 0x1ca   :  { %v4261_v32 = vpop.f32.mrb[2].mxu1  ;;  %v4936_v33 = vadd.f32 %v4250_v31, %v4053_v29  ;;  %v342_v34 = vpop.f32.mrb[3].mxu0 }
 0x1cb   :  { %v4938_v35 = vadd.f32 %v4261_v32, %v4056_v30  ;;  %v429_v36 = vpop.f32.mrb[3].mxu1  ;;  %v4940_v37 = vadd.f32 %v4053_v29, %v342_v34 }
 0x1cc   :  { %v4942_v38 = vadd.f32 %v4056_v30, %v429_v36 }
 0x1cd   :  { %v512_v39 = vpop.f32.mrb[4].mxu0 }
 0x1ce   :  { %v609_v40 = vpop.f32.mrb[4].mxu1  ;;  %v516_v41 = vadd.f32 %v512_v39, %v4940_v37  ;;  %v4266_v42 = vpop.f32.mrb[5].mxu0 }
 0x1cf   :  { %v4271_v43 = vpop.f32.mrb[5].mxu1  ;;  %v613_v44 = vadd.f32 %v609_v40, %v4942_v38 }
 0x1d0   :  { %4458 = vtanh.f32 %v516_v41  ;;  %v4060_v47 = vmul.f32 -1.442695, %v516_v41 }
 0x1d1   :  { %4460 = vtanh.f32 %v613_v44  ;;  %v4061_v48 = vmul.f32 -1.442695, %v613_v44 }
 0x1d2   :  { %4462 = vpow2.f32 %v4060_v47 }
 0x1d3   :  { %4464 = vpow2.f32 %v4061_v48 }
 0x1da   :  { %v4459_v45 = vpop.eup %4458 }
 0x1db   :  { %526 = vrot.lane.b32.xlu0 %v4459_v45, %s4741_s5  ;;  %v4461_v46 = vpop.eup %4460 }
 0x1dc   :  { %v4463_v49 = vpop.eup %4462 }
 0x1dd   :  { %v520_v50 = vadd.f32 1.0, %v4463_v49  ;;  %v4465_v51 = vpop.eup %4464 }
 0x1de   :  { %v617_v52 = vadd.f32 1.0, %v4465_v51 }
 0x1df   :  { %623 = vrot.lane.b32.xlu0 %v4461_v46, %s4742_s13  ;;  %4466 = vrcp.f32 %v520_v50 }
 0x1e0   :  { %4468 = vrcp.f32 %v617_v52 }
 0x1e9   :  { %v4467_v53 = vpop.eup %4466 }
 0x1ea   :  { %v4469_v56 = vpop.eup %4468  ;;  %v524_v59 = vmul.f32 0.0, %v4467_v53 }
 0x1eb   :  { %v621_v62 = vmul.f32 0.0, %v4469_v56 }
 0x24d   :  { %v527_v54 = vpop.permute.xlu0 %526 }
 0x24e   :  { %v529_v55 = vmul.f32 %v4467_v53, %v527_v54 }
 0x250   :  { %531 = vrot.lane.b32.xlu1 %v529_v55, %s4743_s23 }
 0x251   :  { %v624_v57 = vpop.permute.xlu0 %623 }
 0x252   :  { %v626_v58 = vmul.f32 %v4469_v56, %v624_v57 }
 0x254   :  { %628 = vrot.lane.b32.xlu1 %v626_v58, %s4744_s24 }
 0x2c2   :  { %v532_v60 = vpop.permute.xlu1 %531 }
 0x2c3   :  { %v4950_v61 = vadd.f32 %v532_v60, %v524_v59 }
 0x2c5   :  { %4470 = vtanh.f32 %v4950_v61  ;;  %v725_v36 = vrot.slane %v4950_v61, 6 }
 0x2c6   :  { %v629_v63 = vpop.permute.xlu1 %628 }
 0x2c7   :  { %v4953_v0 = vadd.f32 %v629_v63, %v621_v62 }
 0x2c9   :  { %4472 = vtanh.f32 %v4953_v0  ;;  %v831_v41 = vrot.slane %v4953_v0, 6 }
 0x2cf   :  { %v4471_v1 = vpop.eup %4470 }
 0x2d0   :  { %537 = vrot.lane.b32.xlu0 %v4471_v1, %s4744_s24 }
 0x2d3   :  { %v4473_v2 = vpop.eup %4472 }
 0x2d4   :  { %634 = vrot.lane.b32.xlu1 %v4473_v2, %s4745_s25 }
 0x342   :  { %v538_v3 = vpop.permute.xlu0 %537 }
 0x343   :  { %v4958_v4 = vmul.f32 %v4467_v53, %v538_v3 }
 0x345   :  { %639 = vrot.lane.b32.xlu0 %v4958_v4, %s4746_s26 }
 0x346   :  { %v635_v5 = vpop.permute.xlu1 %634 }
 0x347   :  { %v4962_v6 = vmul.f32 %v4469_v56, %v635_v5 }
 0x349   :  { %745 = vrot.lane.b32.xlu1 %v4962_v6, %s4747_s27 }
 0x3b7   :  { %v640_v7 = vpop.permute.xlu0 %639 }
 0x3b8   :  { %4275 = vmatmul.mubr.msk.f32.vlgmr.msra.gmra.mrb[6].mxu0 %vm438_vm4, %v640_v7 }
 0x3b9   :  { %4283 = vmatpush3.msk.msra.mxu0 %vm442_vm2, %v4903_v27  ;;  %4284 = vmatprep.mubr.msk.f32.mxu0 %vm4740_vm3, %v4739_v16 }
 0x3ba   :  { %4292 = vmatprep.subr.mxu0 %v4739_v16 }
 0x3bb   :  { %v746_v8 = vpop.permute.xlu1 %745 }
 0x3bc   :  { %4280 = vmatmul.mubr.msk.f32.vlgmr.msra.gmra.mrb[6].mxu1 %vm100_vm0, %v746_v8 }
 0x3bd   :  { %4288 = vmatpush3.msra.mxu1 %v4908_v28  ;;  %4289 = vmatprep.mubr.msk.f32.mxu1 %vm4740_vm3, %v4739_v16 }
 0x3be   :  { %4297 = vmatprep.subr.mxu1 %v4739_v16 }
 0x48b   :  { %v709_v9 = vpop.f32.mrb[6].mxu0 }
 0x48c   :  { %v714_v10 = vrot.slane %v709_v9, 6  ;;  %v4276_v11 = vpop.f32.mrb[7].mxu0 }
 0x48e   :  { %v716_v12 = vadd.f32 %v714_v10, %v4940_v37 }
 0x48f   :  { %v815_v13 = vpop.f32.mrb[6].mxu1 }
 0x490   :  { %4474 = vtanh.f32 %v716_v12  ;;  %v820_v14 = vrot.slane %v815_v13, 6  ;;  %v4281_v15 = vpop.f32.mrb[7].mxu1  ;;  %v4064_v20 = vmul.f32 -1.442695, %v716_v12 }
 0x492   :  { %v822_v17 = vadd.f32 %v820_v14, %v4942_v38 }
 0x494   :  { %4476 = vtanh.f32 %v822_v17  ;;  %v4066_v21 = vmul.f32 -1.442695, %v822_v17 }
 0x495   :  { %4478 = vpow2.f32 %v4064_v20 }
 0x496   :  { %4480 = vpow2.f32 %v4066_v21 }
 0x49a   :  { %v4475_v18 = vpop.eup %4474 }
 0x49b   :  { %729 = vrot.lane.b32.xlu0 %v4475_v18, %s4741_s5 }
 0x49e   :  { %v4477_v19 = vpop.eup %4476 }
 0x49f   :  { %835 = vrot.lane.b32.xlu1 %v4477_v19, %s4742_s13  ;;  %v4479_v22 = vpop.eup %4478 }
 0x4a0   :  { %v720_v23 = vadd.f32 1.0, %v4479_v22  ;;  %v4481_v24 = vpop.eup %4480 }
 0x4a1   :  { %v826_v25 = vadd.f32 1.0, %v4481_v24 }
 0x4a2   :  { %4482 = vrcp.f32 %v720_v23 }
 0x4a3   :  { %4484 = vrcp.f32 %v826_v25 }
 0x4ac   :  { %v4483_v26 = vpop.eup %4482 }
 0x4ad   :  { %v4485_v31 = vpop.eup %4484  ;;  %v727_v39 = vmul.f32 %v4483_v26, %v725_v36 }
 0x4ae   :  { %v833_v43 = vmul.f32 %v4485_v31, %v831_v41 }
 0x50d   :  { %v730_v29 = vpop.permute.xlu0 %729 }
 0x50e   :  { %v732_v30 = vmul.f32 %v4483_v26, %v730_v29 }
 0x510   :  { %734 = vrot.lane.b32.xlu0 %v732_v30, %s4743_s23 }
 0x511   :  { %v836_v32 = vpop.permute.xlu1 %835 }
 0x512   :  { %v838_v34 = vmul.f32 %v4485_v31, %v836_v32 }
 0x514   :  { %840 = vrot.lane.b32.xlu1 %v838_v34, %s4744_s24 }
 0x582   :  { %v735_v40 = vpop.permute.xlu0 %734 }
 0x583   :  { %v737_v42 = vadd.f32 %v735_v40, %v727_v39 }
 0x585   :  { %4486 = vtanh.f32 %v737_v42  ;;  %v938_v17 = vrot.slane %v737_v42, 6 }
 0x586   :  { %v841_v44 = vpop.permute.xlu1 %840 }
 0x587   :  { %v4985_v45 = vadd.f32 %v841_v44, %v833_v43 }
 0x589   :  { %4488 = vtanh.f32 %v4985_v45  ;;  %v1045_v20 = vrot.slane %v4985_v45, 6 }
 0x58f   :  { %v4487_v46 = vpop.eup %4486 }
 0x590   :  { %740 = vrot.lane.b32.xlu0 %v4487_v46, %s4744_s24 }
 0x593   :  { %v4489_v47 = vpop.eup %4488 }
 0x594   :  { %846 = vrot.lane.b32.xlu1 %v4489_v47, %s4745_s25 }
 0x602   :  { %v741_v48 = vpop.permute.xlu0 %740 }
 0x603   :  { %v4990_v49 = vmul.f32 %v4483_v26, %v741_v48 }
 0x605   :  { %v851_v50 = vrot.slane %v4990_v49, 2 }
 0x606   :  { %v847_v51 = vpop.permute.xlu1 %846 }
 0x607   :  { %v4993_v52 = vmul.f32 %v4485_v31, %v847_v51  ;;  %852 = vrot.lane.b32.xlu0 %v851_v50, %s4746_s26  ;;  %v2127_v31 = vsel %vm2126_vm5, %v4958_v4, %v4990_v49 }
 0x609   :  { %v958_v53 = vrot.slane %v4993_v52, 2  ;;  %v2134_v40 = vsel %vm2126_vm5, %v4962_v6, %v4993_v52 }
 0x60b   :  { %959 = vrot.lane.b32.xlu1 %v958_v53, %s4747_s27 }
 0x679   :  { %v853_v54 = vpop.permute.xlu0 %852 }
 0x67a   :  { %4285 = vmatmul.mubr.msk.f32.vlgmr.msra.gmra.mrb[8].mxu0 %vm438_vm4, %v853_v54 }
 0x67b   :  { %4293 = vmatpush3.msk.msra.mxu0 %vm442_vm2, %v4903_v27  ;;  %4294 = vmatprep.mubr.msk.f32.mxu0 %vm4740_vm3, %v4739_v16 }
 0x67c   :  { %4302 = vmatprep.subr.mxu0 %v4739_v16 }
 0x67d   :  { %v960_v55 = vpop.permute.xlu1 %959 }
 0x67e   :  { %4290 = vmatmul.mubr.msk.f32.vlgmr.msra.gmra.mrb[8].mxu1 %vm100_vm0, %v960_v55 }
 0x67f   :  { %4298 = vmatpush3.msra.mxu1 %v4908_v28  ;;  %4299 = vmatprep.mubr.msk.f32.mxu1 %vm4740_vm3, %v4739_v16 }
 0x680   :  { %4307 = vmatprep.subr.mxu1 %v4739_v16 }
 0x74d   :  { %v922_v56 = vpop.f32.mrb[8].mxu0 }
 0x74e   :  { %v927_v57 = vrot.slane %v922_v56, 4  ;;  %v4286_v58 = vpop.f32.mrb[9].mxu0 }
 0x750   :  { %v929_v59 = vadd.f32 %v927_v57, %v4940_v37 }
 0x751   :  { %v1029_v60 = vpop.f32.mrb[8].mxu1 }
 0x752   :  { %4490 = vtanh.f32 %v929_v59  ;;  %v1034_v61 = vrot.slane %v1029_v60, 4  ;;  %v4291_v62 = vpop.f32.mrb[9].mxu1  ;;  %v4069_v2 = vmul.f32 -1.442695, %v929_v59 }
 0x754   :  { %v1036_v63 = vadd.f32 %v1034_v61, %v4942_v38 }
 0x756   :  { %4492 = vtanh.f32 %v1036_v63  ;;  %v4071_v3 = vmul.f32 -1.442695, %v1036_v63 }
 0x757   :  { %4494 = vpow2.f32 %v4069_v2 }
 0x758   :  { %4496 = vpow2.f32 %v4071_v3 }
 0x75c   :  { %v4491_v0 = vpop.eup %4490 }
 0x75d   :  { %942 = vrot.lane.b32.xlu0 %v4491_v0, %s4741_s5 }
 0x760   :  { %v4493_v1 = vpop.eup %4492 }
 0x761   :  { %1049 = vrot.lane.b32.xlu1 %v4493_v1, %s4742_s13  ;;  %v4495_v5 = vpop.eup %4494 }
 0x762   :  { %v933_v7 = vadd.f32 1.0, %v4495_v5  ;;  %v4497_v8 = vpop.eup %4496 }
 0x763   :  { %v1040_v9 = vadd.f32 1.0, %v4497_v8 }
 0x764   :  { %4498 = vrcp.f32 %v933_v7 }
 0x765   :  { %4500 = vrcp.f32 %v1040_v9 }
 0x76e   :  { %v4499_v10 = vpop.eup %4498 }
 0x76f   :  { %v4501_v13 = vpop.eup %4500  ;;  %v940_v18 = vmul.f32 %v4499_v10, %v938_v17 }
 0x770   :  { %v1047_v22 = vmul.f32 %v4501_v13, %v1045_v20 }
 0x7cf   :  { %v943_v11 = vpop.permute.xlu0 %942 }
 0x7d0   :  { %v945_v12 = vmul.f32 %v4499_v10, %v943_v11 }
 0x7d2   :  { %947 = vrot.lane.b32.xlu0 %v945_v12, %s4743_s23 }
 0x7d3   :  { %v1050_v14 = vpop.permute.xlu1 %1049 }
 0x7d4   :  { %v1052_v15 = vmul.f32 %v4501_v13, %v1050_v14 }
 0x7d6   :  { %1054 = vrot.lane.b32.xlu1 %v1052_v15, %s4744_s24 }
 0x844   :  { %v948_v19 = vpop.permute.xlu0 %947 }
 0x845   :  { %v5016_v21 = vadd.f32 %v948_v19, %v940_v18 }
 0x847   :  { %4502 = vtanh.f32 %v5016_v21  ;;  %v1152_v63 = vrot.slane %v5016_v21, 6 }
 0x848   :  { %v1055_v23 = vpop.permute.xlu1 %1054 }
 0x849   :  { %v5019_v24 = vadd.f32 %v1055_v23, %v1047_v22 }
 0x84b   :  { %4504 = vtanh.f32 %v5019_v24  ;;  %v1259_v2 = vrot.slane %v5019_v24, 6 }
 0x851   :  { %v4503_v25 = vpop.eup %4502 }
 0x852   :  { %953 = vrot.lane.b32.xlu0 %v4503_v25, %s4744_s24 }
 0x855   :  { %v4505_v26 = vpop.eup %4504 }
 0x856   :  { %1060 = vrot.lane.b32.xlu1 %v4505_v26, %s4745_s25 }
 0x8c4   :  { %v954_v29 = vpop.permute.xlu0 %953 }
 0x8c5   :  { %v956_v30 = vmul.f32 %v4499_v10, %v954_v29 }
 0x8c7   :  { %v1065_v32 = vrot.slane %v956_v30, 4  ;;  %v5028_v34 = vsel %vm442_vm2, %v2127_v31, %v956_v30 }
 0x8c8   :  { %v1061_v36 = vpop.permute.xlu1 %1060 }
 0x8c9   :  { %v1063_v39 = vmul.f32 %v4501_v13, %v1061_v36  ;;  %1066 = vrot.lane.b32.xlu0 %v1065_v32, %s4746_s26 }
 0x8cb   :  { %v1172_v41 = vrot.slane %v1063_v39, 4  ;;  %v5035_v42 = vsel %vm442_vm2, %v2134_v40, %v1063_v39 }
 0x8cd   :  { %1173 = vrot.lane.b32.xlu1 %v1172_v41, %s4747_s27 }
 0x93b   :  { %v1067_v43 = vpop.permute.xlu0 %1066 }
 0x93c   :  { %4295 = vmatmul.mubr.msk.f32.vlgmr.msra.gmra.mrb[10].mxu0 %vm438_vm4, %v1067_v43 }
 0x93d   :  { %4303 = vmatpush3.msk.msra.mxu0 %vm442_vm2, %v4903_v27  ;;  %4304 = vmatprep.mubr.msk.f32.mxu0 %vm4740_vm3, %v4739_v16 }
 0x93e   :  { %4312 = vmatprep.subr.mxu0 %v4739_v16 }
 0x93f   :  { %v1174_v4 = vpop.permute.xlu1 %1173 }
 0x940   :  { %4300 = vmatmul.mubr.msk.f32.vlgmr.msra.gmra.mrb[10].mxu1 %vm100_vm0, %v1174_v4 }
 0x941   :  { %4308 = vmatpush3.msra.mxu1 %v4908_v28  ;;  %4309 = vmatprep.mubr.msk.f32.mxu1 %vm4740_vm3, %v4739_v16 }
 0x942   :  { %4317 = vmatprep.subr.mxu1 %v4739_v16 }
 0xa0f   :  { %v1136_v6 = vpop.f32.mrb[10].mxu0 }
 0xa10   :  { %v1141_v44 = vrot.slane %v1136_v6, 2  ;;  %v4296_v45 = vpop.f32.mrb[11].mxu0 }
 0xa12   :  { %v1143_v46 = vadd.f32 %v1141_v44, %v4940_v37 }
 0xa13   :  { %v1243_v47 = vpop.f32.mrb[10].mxu1 }
 0xa14   :  { %4506 = vtanh.f32 %v1143_v46  ;;  %v1248_v48 = vrot.slane %v1243_v47, 2  ;;  %v4301_v49 = vpop.f32.mrb[11].mxu1  ;;  %v4074_v53 = vmul.f32 -1.442695, %v1143_v46 }
 0xa16   :  { %v1250_v50 = vadd.f32 %v1248_v48, %v4942_v38 }
 0xa18   :  { %4508 = vtanh.f32 %v1250_v50  ;;  %v4076_v54 = vmul.f32 -1.442695, %v1250_v50 }
 0xa19   :  { %4510 = vpow2.f32 %v4074_v53 }
 0xa1a   :  { %4512 = vpow2.f32 %v4076_v54 }
 0xa1e   :  { %v4507_v51 = vpop.eup %4506 }
 0xa1f   :  { %1156 = vrot.lane.b32.xlu0 %v4507_v51, %s4741_s5 }
 0xa22   :  { %v4509_v52 = vpop.eup %4508 }
 0xa23   :  { %1263 = vrot.lane.b32.xlu1 %v4509_v52, %s4742_s13  ;;  %v4511_v55 = vpop.eup %4510 }
 0xa24   :  { %v1147_v56 = vadd.f32 1.0, %v4511_v55  ;;  %v4513_v37 = vpop.eup %4512 }
 0xa25   :  { %v1254_v57 = vadd.f32 1.0, %v4513_v37 }
 0xa26   :  { %4514 = vrcp.f32 %v1147_v56 }
 0xa27   :  { %4516 = vrcp.f32 %v1254_v57 }
 0xa30   :  { %v4515_v58 = vpop.eup %4514 }
 0xa31   :  { %v4517_v60 = vpop.eup %4516  ;;  %v1154_v0 = vmul.f32 %v4515_v58, %v1152_v63 }
 0xa32   :  { %v1261_v5 = vmul.f32 %v4517_v60, %v1259_v2 }
 0xa91   :  { %v1157_v59 = vpop.permute.xlu0 %1156 }
 0xa92   :  { %v1159_v38 = vmul.f32 %v4515_v58, %v1157_v59 }
 0xa94   :  { %1161 = vrot.lane.b32.xlu0 %v1159_v38, %s4743_s23 }
 0xa95   :  { %v1264_v61 = vpop.permute.xlu1 %1263 }
 0xa96   :  { %v1266_v62 = vmul.f32 %v4517_v60, %v1264_v61 }
 0xa98   :  { %1268 = vrot.lane.b32.xlu1 %v1266_v62, %s4744_s24 }
 0xb06   :  { %v1162_v1 = vpop.permute.xlu0 %1161 }
 0xb07   :  { %v5057_v3 = vadd.f32 %v1162_v1, %v1154_v0 }
 0xb09   :  { %4518 = vtanh.f32 %v5057_v3  ;;  %v1363_v46 = vrot.slane %v5057_v3, 6 }
 0xb0a   :  { %v1269_v7 = vpop.permute.xlu1 %1268 }
 0xb0b   :  { %v5060_v8 = vadd.f32 %v1269_v7, %v1261_v5 }
 0xb0d   :  { %4520 = vtanh.f32 %v5060_v8  ;;  %v1467_v49 = vrot.slane %v5060_v8, 6 }
 0xb13   :  { %v4519_v9 = vpop.eup %4518 }
 0xb14   :  { %1167 = vrot.lane.b32.xlu0 %v4519_v9, %s4744_s24 }
 0xb17   :  { %v4521_v10 = vpop.eup %4520 }
 0xb18   :  { %1274 = vrot.lane.b32.xlu1 %v4521_v10, %s4745_s25 }
 0xb86   :  { %v1168_v11 = vpop.permute.xlu0 %1167 }
 0xb87   :  { %v1170_v12 = vmul.f32 %v4515_v58, %v1168_v11 }
 0xb89   :  { %v1279_v13 = vrot.slane %v1170_v12, 6  ;;  %v5067_v14 = vsel %vm2129_vm6, %v5028_v34, %v1170_v12 }
 0xb8a   :  { %v1275_v15 = vpop.permute.xlu1 %1274 }
 0xb8b   :  { %v1277_v17 = vmul.f32 %v4517_v60, %v1275_v15  ;;  %1280 = vrot.lane.b32.xlu0 %v1279_v13, %s4746_s26 }
 0xb8d   :  { %v1383_v18 = vrot.slane %v1277_v17, 6  ;;  %v5072_v19 = vsel %vm2129_vm6, %v5035_v42, %v1277_v17 }
 0xb8f   :  { %1384 = vrot.lane.b32.xlu1 %v1383_v18, %s4747_s27 }
 0xbfd   :  { %v1281_v20 = vpop.permute.xlu0 %1280 }
 0xbfe   :  { %4305 = vmatmul.mubr.msk.f32.vlgmr.msra.gmra.mrb[12].mxu0 %vm438_vm4, %v1281_v20 }
 0xbff   :  { %4313 = vmatpush3.msk.msra.mxu0 %vm442_vm2, %v4903_v27  ;;  %4314 = vmatprep.mubr.msk.f32.mxu0 %vm4740_vm3, %v4739_v16 }
 0xc00   :  { %4322 = vmatprep.subr.mxu0 %v4739_v16 }
 0xc01   :  { %v1385_v21 = vpop.permute.xlu1 %1384 }
 0xc02   :  { %4310 = vmatmul.mubr.msk.f32.vlgmr.msra.gmra.mrb[12].mxu1 %vm100_vm0, %v1385_v21 }
 0xc03   :  { %4318 = vmatpush3.msra.mxu1 %v4908_v28  ;;  %4319 = vmatprep.mubr.msk.f32.mxu1 %vm4740_vm3, %v4739_v16 }
 0xc04   :  { %4327 = vmatprep.subr.mxu1 %v4739_v16 }
 0xcd1   :  { %v1350_v22 = vpop.f32.mrb[12].mxu0 }
 0xcd2   :  { %v1354_v23 = vadd.f32 %v1350_v22, %v4936_v33  ;;  %v4306_v24 = vpop.f32.mrb[13].mxu0 }
 0xcd4   :  { %4522 = vtanh.f32 %v1354_v23  ;;  %v4079_v32 = vmul.f32 -1.442695, %v1354_v23 }
 0xcd5   :  { %v1454_v25 = vpop.f32.mrb[12].mxu1 }
 0xcd6   :  { %v1458_v26 = vadd.f32 %v1454_v25, %v4938_v35  ;;  %v4311_v29 = vpop.f32.mrb[13].mxu1 }
 0xcd8   :  { %4524 = vtanh.f32 %v1458_v26  ;;  %v4081_v34 = vmul.f32 -1.442695, %v1458_v26 }
 0xcd9   :  { %4526 = vpow2.f32 %v4079_v32 }
 0xcda   :  { %4528 = vpow2.f32 %v4081_v34 }
 0xcde   :  { %v4523_v30 = vpop.eup %4522 }
 0xcdf   :  { %1367 = vrot.lane.b32.xlu0 %v4523_v30, %s4741_s5 }
 0xce2   :  { %v4525_v31 = vpop.eup %4524 }
 0xce3   :  { %1471 = vrot.lane.b32.xlu1 %v4525_v31, %s4742_s13  ;;  %v4527_v36 = vpop.eup %4526 }
 0xce4   :  { %v1358_v39 = vadd.f32 1.0, %v4527_v36  ;;  %v4529_v40 = vpop.eup %4528 }
 0xce5   :  { %v1462_v41 = vadd.f32 1.0, %v4529_v40 }
 0xce6   :  { %4530 = vrcp.f32 %v1358_v39 }
 0xce7   :  { %4532 = vrcp.f32 %v1462_v41 }
 0xcf0   :  { %v4531_v42 = vpop.eup %4530 }
 0xcf1   :  { %v4533_v6 = vpop.eup %4532  ;;  %v1365_v47 = vmul.f32 %v4531_v42, %v1363_v46 }
 0xcf2   :  { %v1469_v51 = vmul.f32 %v4533_v6, %v1467_v49 }
 0xd51   :  { %v1368_v43 = vpop.permute.xlu0 %1367 }
 0xd52   :  { %v1370_v4 = vmul.f32 %v4531_v42, %v1368_v43 }
 0xd54   :  { %1372 = vrot.lane.b32.xlu0 %v1370_v4, %s4743_s23 }
 0xd55   :  { %v1472_v44 = vpop.permute.xlu1 %1471 }
 0xd56   :  { %v1474_v45 = vmul.f32 %v4533_v6, %v1472_v44 }
 0xd58   :  { %1476 = vrot.lane.b32.xlu1 %v1474_v45, %s4744_s24 }
 0xdc6   :  { %v1373_v48 = vpop.permute.xlu0 %1372 }
 0xdc7   :  { %v1375_v50 = vadd.f32 %v1373_v48, %v1365_v47 }
 0xdc9   :  { %4534 = vtanh.f32 %v1375_v50  ;;  %v1573_v23 = vrot.slane %v1375_v50, 6 }
 0xdca   :  { %v1477_v52 = vpop.permute.xlu1 %1476 }
 0xdcb   :  { %v1479_v53 = vadd.f32 %v1477_v52, %v1469_v51 }
 0xdcd   :  { %4536 = vtanh.f32 %v1479_v53  ;;  %v1679_v26 = vrot.slane %v1479_v53, 6 }
 0xdd3   :  { %v4535_v54 = vpop.eup %4534 }
 0xdd4   :  { %1378 = vrot.lane.b32.xlu0 %v4535_v54, %s4744_s24 }
 0xdd7   :  { %v4537_v55 = vpop.eup %4536 }
 0xdd8   :  { %1482 = vrot.lane.b32.xlu1 %v4537_v55, %s4745_s25 }
 0xe46   :  { %v1379_v56 = vpop.permute.xlu0 %1378 }
 0xe47   :  { %v5096_v37 = vmul.f32 %v4531_v42, %v1379_v56 }
 0xe49   :  { %1487 = vrot.lane.b32.xlu0 %v5096_v37, %s4746_s26 }
 0xe4a   :  { %v1483_v57 = vpop.permute.xlu1 %1482 }
 0xe4b   :  { %v5100_v58 = vmul.f32 %v4533_v6, %v1483_v57 }
 0xe4d   :  { %1593 = vrot.lane.b32.xlu1 %v5100_v58, %s4747_s27 }
 0xebb   :  { %v1488_v59 = vpop.permute.xlu0 %1487 }
 0xebc   :  { %4315 = vmatmul.mubr.msk.f32.vlgmr.msra.gmra.mrb[14].mxu0 %vm438_vm4, %v1488_v59 }
 0xebd   :  { %4323 = vmatpush3.msk.msra.mxu0 %vm442_vm2, %v4903_v27  ;;  %4324 = vmatprep.mubr.msk.f32.mxu0 %vm4740_vm3, %v4739_v16 }
 0xebe   :  { %4332 = vmatprep.subr.mxu0 %v4739_v16 }
 0xebf   :  { %v1594_v38 = vpop.permute.xlu1 %1593 }
 0xec0   :  { %4320 = vmatmul.mubr.msk.f32.vlgmr.msra.gmra.mrb[14].mxu1 %vm100_vm0, %v1594_v38 }
 0xec1   :  { %4328 = vmatpush3.msra.mxu1 %v4908_v28  ;;  %4329 = vmatprep.mubr.msk.f32.mxu1 %vm4740_vm3, %v4739_v16 }
 0xec2   :  { %4337 = vmatprep.subr.mxu1 %v4739_v16 }
 0xf8f   :  { %v1557_v60 = vpop.f32.mrb[14].mxu0 }
 0xf90   :  { %v1562_v61 = vrot.slane %v1557_v60, 6  ;;  %v4316_v62 = vpop.f32.mrb[15].mxu0 }
 0xf92   :  { %v1564_v63 = vadd.f32 %v1562_v61, %v4936_v33 }
 0xf93   :  { %v1663_v0 = vpop.f32.mrb[14].mxu1 }
 0xf94   :  { %4538 = vtanh.f32 %v1564_v63  ;;  %v1668_v1 = vrot.slane %v1663_v0, 6  ;;  %v4321_v2 = vpop.f32.mrb[15].mxu1  ;;  %v4084_v8 = vmul.f32 -1.442695, %v1564_v63 }
 0xf96   :  { %v1670_v3 = vadd.f32 %v1668_v1, %v4938_v35 }
 0xf98   :  { %4540 = vtanh.f32 %v1670_v3  ;;  %v4086_v9 = vmul.f32 -1.442695, %v1670_v3 }
 0xf99   :  { %4542 = vpow2.f32 %v4084_v8 }
 0xf9a   :  { %4544 = vpow2.f32 %v4086_v9 }
 0xf9e   :  { %v4539_v5 = vpop.eup %4538 }
 0xf9f   :  { %1577 = vrot.lane.b32.xlu0 %v4539_v5, %s4741_s5 }
 0xfa2   :  { %v4541_v7 = vpop.eup %4540 }
 0xfa3   :  { %1683 = vrot.lane.b32.xlu1 %v4541_v7, %s4742_s13  ;;  %v4543_v10 = vpop.eup %4542 }
 0xfa4   :  { %v1568_v11 = vadd.f32 1.0, %v4543_v10  ;;  %v4545_v12 = vpop.eup %4544 }
 0xfa5   :  { %v1674_v13 = vadd.f32 1.0, %v4545_v12 }
 0xfa6   :  { %4546 = vrcp.f32 %v1568_v11 }
 0xfa7   :  { %4548 = vrcp.f32 %v1674_v13 }
 0xfb0   :  { %v4547_v15 = vpop.eup %4546 }
 0xfb1   :  { %v4549_v20 = vpop.eup %4548  ;;  %v1575_v24 = vmul.f32 %v4547_v15, %v1573_v23 }
 0xfb2   :  { %v1681_v30 = vmul.f32 %v4549_v20, %v1679_v26 }
0x1011   :  { %v1578_v17 = vpop.permute.xlu0 %1577 }
0x1012   :  { %v1580_v18 = vmul.f32 %v4547_v15, %v1578_v17 }
0x1014   :  { %1582 = vrot.lane.b32.xlu0 %v1580_v18, %s4743_s23 }
0x1015   :  { %v1684_v21 = vpop.permute.xlu1 %1683 }
0x1016   :  { %v1686_v22 = vmul.f32 %v4549_v20, %v1684_v21 }
0x1018   :  { %1688 = vrot.lane.b32.xlu1 %v1686_v22, %s4744_s24 }
0x1086   :  { %v1583_v25 = vpop.permute.xlu0 %1582 }
0x1087   :  { %v1585_v29 = vadd.f32 %v1583_v25, %v1575_v24 }
0x1089   :  { %4550 = vtanh.f32 %v1585_v29  ;;  %v1786_v1 = vrot.slane %v1585_v29, 6 }
0x108a   :  { %v1689_v31 = vpop.permute.xlu1 %1688 }
0x108b   :  { %v1691_v32 = vadd.f32 %v1689_v31, %v1681_v30 }
0x108d   :  { %4552 = vtanh.f32 %v1691_v32  ;;  %v1893_v5 = vrot.slane %v1691_v32, 6 }
0x1093   :  { %v4551_v34 = vpop.eup %4550 }
0x1094   :  { %1588 = vrot.lane.b32.xlu0 %v4551_v34, %s4744_s24 }
0x1097   :  { %v4553_v36 = vpop.eup %4552 }
0x1098   :  { %1694 = vrot.lane.b32.xlu1 %v4553_v36, %s4745_s25 }
0x1106   :  { %v1589_v39 = vpop.permute.xlu0 %1588 }
0x1107   :  { %v5123_v40 = vmul.f32 %v4547_v15, %v1589_v39 }
0x1109   :  { %v1699_v41 = vrot.slane %v5123_v40, 2  ;;  %v2131_v17 = vsel %vm2126_vm5, %v5096_v37, %v5123_v40 }
0x110a   :  { %v1695_v42 = vpop.permute.xlu1 %1694 }
0x110b   :  { %v5126_v43 = vmul.f32 %v4549_v20, %v1695_v42  ;;  %1700 = vrot.lane.b32.xlu0 %v1699_v41, %s4746_s26 }
0x110d   :  { %v1806_v4 = vrot.slane %v5126_v43, 2  ;;  %v2137_v23 = vsel %vm2126_vm5, %v5100_v58, %v5126_v43 }
0x110f   :  { %1807 = vrot.lane.b32.xlu1 %v1806_v4, %s4747_s27 }
0x117d   :  { %v1701_v6 = vpop.permute.xlu0 %1700 }
0x117e   :  { %4325 = vmatmul.mubr.msk.f32.vlgmr.msra.gmra.mrb[16].mxu0 %vm438_vm4, %v1701_v6 }
0x117f   :  { %4333 = vmatpush3.msk.msra.mxu0 %vm442_vm2, %v4903_v27  ;;  %4334 = vmatprep.mubr.msk.f32.mxu0 %vm4740_vm3, %v4739_v16 }
0x1181   :  { %v1808_v44 = vpop.permute.xlu1 %1807 }
0x1182   :  { %4330 = vmatmul.mubr.msk.f32.vlgmr.msra.gmra.mrb[16].mxu1 %vm100_vm0, %v1808_v44 }
0x1183   :  { %4338 = vmatpush3.msra.mxu1 %v4908_v28  ;;  %4339 = vmatprep.mubr.msk.f32.mxu1 %vm4740_vm3, %v4739_v16 }
0x1251   :  { %v1770_v45 = vpop.f32.mrb[16].mxu0 }
0x1252   :  { %v1775_v46 = vrot.slane %v1770_v45, 4  ;;  %v4326_v47 = vpop.f32.mrb[17].mxu0 }
0x1254   :  { %v1777_v48 = vadd.f32 %v1775_v46, %v4936_v33 }
0x1255   :  { %v1877_v49 = vpop.f32.mrb[16].mxu1 }
0x1256   :  { %4554 = vtanh.f32 %v1777_v48  ;;  %v1882_v50 = vrot.slane %v1877_v49, 4  ;;  %v4331_v27 = vpop.f32.mrb[17].mxu1  ;;  %v4089_v28 = vmul.f32 -1.442695, %v1777_v48 }
0x1258   :  { %v1884_v51 = vadd.f32 %v1882_v50, %v4938_v35 }
0x125a   :  { %4556 = vtanh.f32 %v1884_v51  ;;  %v4091_v54 = vmul.f32 -1.442695, %v1884_v51 }
0x125b   :  { %4558 = vpow2.f32 %v4089_v28 }
0x125c   :  { %4560 = vpow2.f32 %v4091_v54 }
0x1260   :  { %v4555_v52 = vpop.eup %4554 }
0x1261   :  { %1790 = vrot.lane.b32.xlu0 %v4555_v52, %s4741_s5 }
0x1264   :  { %v4557_v53 = vpop.eup %4556 }
0x1265   :  { %1897 = vrot.lane.b32.xlu1 %v4557_v53, %s4742_s13  ;;  %v4559_v55 = vpop.eup %4558 }
0x1266   :  { %v1781_v56 = vadd.f32 1.0, %v4559_v55  ;;  %v4561_v57 = vpop.eup %4560 }
0x1267   :  { %v1888_v59 = vadd.f32 1.0, %v4561_v57  ;;  %v91_v57 = vld [vmem:[%s5496_s14] sm:$0xff] }
0x1268   :  { %4562 = vrcp.f32 %v1781_v56  ;;  %v80_v56 = vld [vmem:[%s5488_s6] sm:$0xf]  ;;  %4347 = vmatprep.subr.mxu1 %v91_v57 }
0x1269   :  { %4564 = vrcp.f32 %v1888_v59  ;;  %4342 = vmatprep.subr.msk.mxu0 %vm442_vm2, %v80_v56 }
0x1272   :  { %v4563_v38 = vpop.eup %4562 }
0x1273   :  { %v4565_v62 = vpop.eup %4564  ;;  %v1788_v2 = vmul.f32 %v4563_v38, %v1786_v1 }
0x1274   :  { %v1895_v8 = vmul.f32 %v4565_v62, %v1893_v5  ;;  %v5207_v5 = vld [vmem:[%s5497_s15] sm:$0xff] }
0x12d3   :  { %v1791_v60 = vpop.permute.xlu0 %1790 }
0x12d4   :  { %v1793_v61 = vmul.f32 %v4563_v38, %v1791_v60 }
0x12d6   :  { %1795 = vrot.lane.b32.xlu0 %v1793_v61, %s4743_s23 }
0x12d7   :  { %v1898_v63 = vpop.permute.xlu1 %1897 }
0x12d8   :  { %v1900_v0 = vmul.f32 %v4565_v62, %v1898_v63 }
0x12da   :  { %1902 = vrot.lane.b32.xlu1 %v1900_v0, %s4744_s24 }
0x1348   :  { %v1796_v3 = vpop.permute.xlu0 %1795 }
0x1349   :  { %v1798_v7 = vadd.f32 %v1796_v3, %v1788_v2 }
0x134b   :  { %4566 = vtanh.f32 %v1798_v7  ;;  %v2000_v50 = vrot.slane %v1798_v7, 6 }
0x134c   :  { %v1903_v9 = vpop.permute.xlu1 %1902 }
0x134d   :  { %v1905_v10 = vadd.f32 %v1903_v9, %v1895_v8  ;;  %v4097_v8 = vld [vmem:[%s5490_s8] ss:$0 sm:$0xff] }
0x134f   :  { %4568 = vtanh.f32 %v1905_v10  ;;  %v2107_v52 = vrot.slane %v1905_v10, 6 }
0x1355   :  { %v4567_v11 = vpop.eup %4566 }
0x1356   :  { %1801 = vrot.lane.b32.xlu0 %v4567_v11, %s4744_s24 }
0x1359   :  { %v4569_v12 = vpop.eup %4568 }
0x135a   :  { %1908 = vrot.lane.b32.xlu1 %v4569_v12, %s4745_s25 }
0x13c8   :  { %v1802_v13 = vpop.permute.xlu0 %1801 }
0x13c9   :  { %v1804_v15 = vmul.f32 %v4563_v38, %v1802_v13  ;;  %v4101_v13 = vld [vmem:[%s5498_s16] ss:$0 sm:$0xff] }
0x13cb   :  { %v1913_v18 = vrot.slane %v1804_v15, 4  ;;  %v5152_v20 = vsel %vm442_vm2, %v2131_v17, %v1804_v15 }
0x13cc   :  { %v1909_v21 = vpop.permute.xlu1 %1908 }
0x13cd   :  { %v1911_v22 = vmul.f32 %v4565_v62, %v1909_v21  ;;  %1914 = vrot.lane.b32.xlu0 %v1913_v18, %s4746_s26 }
0x13cf   :  { %v2020_v24 = vrot.slane %v1911_v22, 4  ;;  %v5159_v25 = vsel %vm442_vm2, %v2137_v23, %v1911_v22 }
0x13d1   :  { %2021 = vrot.lane.b32.xlu1 %v2020_v24, %s4747_s27 }
0x143f   :  { %v1915_v26 = vpop.permute.xlu0 %1914 }
0x1440   :  { %4335 = vmatmul.mubr.msk.f32.vlgmr.msra.gmra.mrb[18].mxu0 %vm438_vm4, %v1915_v26 }
0x1441   :  { %4343 = vmatpush3.msk.msra.mxu0 %vm442_vm2, %v80_v56 }
0x1442   :  { %4352 = vmatprep.subr.mxu0 %v4739_v16 }
0x1443   :  { %v2022_v37 = vpop.permute.xlu1 %2021 }
0x1444   :  { %4340 = vmatmul.mubr.msk.f32.vlgmr.msra.gmra.mrb[18].mxu1 %vm100_vm0, %v2022_v37 }
0x1445   :  { %4348 = vmatpush3.msra.mxu1 %v91_v57 }
0x1446   :  { %4357 = vmatprep.subr.mxu1 %v4739_v16 }
0x1513   :  { %v1984_v29 = vpop.f32.mrb[18].mxu0 }
0x1514   :  { %v1989_v30 = vrot.slane %v1984_v29, 2  ;;  %v4336_v31 = vpop.f32.mrb[19].mxu0 }
0x1516   :  { %v1991_v32 = vadd.f32 %v1989_v30, %v4936_v33 }
0x1517   :  { %v2091_v34 = vpop.f32.mrb[18].mxu1 }
0x1518   :  { %4570 = vtanh.f32 %v1991_v32  ;;  %v2096_v58 = vrot.slane %v2091_v34, 2  ;;  %v4341_v36 = vpop.f32.mrb[19].mxu1  ;;  %v4094_v42 = vmul.f32 -1.442695, %v1991_v32 }
0x151a   :  { %v2098_v39 = vadd.f32 %v2096_v58, %v4938_v35 }
0x151c   :  { %4572 = vtanh.f32 %v2098_v39  ;;  %v4096_v43 = vmul.f32 -1.442695, %v2098_v39 }
0x151d   :  { %4574 = vpow2.f32 %v4094_v42 }
0x151e   :  { %4576 = vpow2.f32 %v4096_v43 }
0x1522   :  { %v4571_v40 = vpop.eup %4570 }
0x1523   :  { %2004 = vrot.lane.b32.xlu0 %v4571_v40, %s4741_s5 }
0x1526   :  { %v4573_v41 = vpop.eup %4572 }
0x1527   :  { %2111 = vrot.lane.b32.xlu1 %v4573_v41, %s4742_s13  ;;  %v4575_v4 = vpop.eup %4574 }
0x1528   :  { %v1995_v6 = vadd.f32 1.0, %v4575_v4  ;;  %v4577_v33 = vpop.eup %4576 }
0x1529   :  { %v2102_v44 = vadd.f32 1.0, %v4577_v33 }
0x152a   :  { %4578 = vrcp.f32 %v1995_v6 }
0x152b   :  { %4580 = vrcp.f32 %v2102_v44 }
0x1534   :  { %v4579_v45 = vpop.eup %4578 }
0x1535   :  { %v4581_v47 = vpop.eup %4580  ;;  %v2002_v27 = vmul.f32 %v4579_v45, %v2000_v50 }
0x1536   :  { %v2109_v28 = vmul.f32 %v4581_v47, %v2107_v52 }
0x1595   :  { %v2005_v46 = vpop.permute.xlu0 %2004 }
0x1596   :  { %v2007_v35 = vmul.f32 %v4579_v45, %v2005_v46 }
0x1598   :  { %2009 = vrot.lane.b32.xlu0 %v2007_v35, %s4743_s23 }
0x1599   :  { %v2112_v48 = vpop.permute.xlu1 %2111 }
0x159a   :  { %v2114_v49 = vmul.f32 %v4581_v47, %v2112_v48 }
0x159c   :  { %2116 = vrot.lane.b32.xlu1 %v2114_v49, %s4744_s24 }
0x160a   :  { %v2010_v51 = vpop.permute.xlu0 %2009 }
0x160b   :  { %v2012_v53 = vadd.f32 %v2010_v51, %v2002_v27 }
0x160d   :  { %4582 = vtanh.f32 %v2012_v53 }
0x160e   :  { %v2117_v54 = vpop.permute.xlu1 %2116 }
0x160f   :  { %v2119_v55 = vadd.f32 %v2117_v54, %v2109_v28 }
0x1611   :  { %4584 = vtanh.f32 %v2119_v55 }
0x1617   :  { %v4583_v59 = vpop.eup %4582 }
0x1618   :  { %2015 = vrot.lane.b32.xlu0 %v4583_v59, %s4744_s24 }
0x161b   :  { %v4585_v38 = vpop.eup %4584 }
0x161c   :  { %2122 = vrot.lane.b32.xlu1 %v4585_v38, %s4745_s25  ;;  %2148 = vrot.lane.b32.xlu0 %v5067_v14, %s4746_s26 }
0x1620   :  { %2242 = vrot.lane.b32.xlu1 %v5072_v19, %s4747_s27  ;;  %v5197_v19 = vld [vmem:[%s5489_s7] sm:$0xf] }
0x168a   :  { %v2016_v60 = vpop.permute.xlu0 %2015 }
0x168b   :  { %v2018_v61 = vmul.f32 %v4579_v45, %v2016_v60 }
0x168d   :  { %v2133_v62 = vsel %vm2129_vm6, %v5152_v20, %v2018_v61 }
0x168e   :  { %v2123_v63 = vpop.permute.xlu1 %2122  ;;  %2150 = vrot.lane.b32.xlu0 %v2133_v62, %s4746_s26  ;;  %v2149_v0 = vpop.permute.xlu0 %2148 }
0x168f   :  { %v2125_v1 = vmul.f32 %v4581_v47, %v2123_v63  ;;  %4344 = vmatprep.mubr.msk.f32.mxu0 %vm438_vm4, %v2149_v0 }
0x1691   :  { %v2139_v2 = vsel %vm2129_vm6, %v5159_v25, %v2125_v1 }
0x1692   :  { %2244 = vrot.lane.b32.xlu1 %v2139_v2, %s4747_s27  ;;  %v2243_v14 = vpop.permute.xlu1 %2242 }
0x1693   :  { %4349 = vmatprep.mubr.msk.f32.mxu1 %vm100_vm0, %v2243_v14 }
0x1700   :  { %v2151_v3 = vpop.permute.xlu0 %2150 }
0x1701   :  { %4345 = vmatmul.mubr.msk.f32.vlgmr.msra.gmra.mrb[20].mxu0 %vm438_vm4, %v2151_v3 }
0x1702   :  { %4353 = vmatpush3.msk.msra.mxu0 %vm442_vm2, %v5197_v19  ;;  %4354 = vmatprep.mubr.msk.f32.mxu0 %vm4740_vm3, %v4739_v16 }
0x1703   :  { %4362 = vmatprep.subr.mxu0 %v4739_v16 }
0x1704   :  { %v2245_v7 = vpop.permute.xlu1 %2244 }
0x1705   :  { %4350 = vmatmul.mubr.msk.f32.vlgmr.msra.gmra.mrb[20].mxu1 %vm100_vm0, %v2245_v7  ;;  %4355 = vmatmul.mubr.f32.vlgmr.msra.gmra.mrb[22].mxu0 %v4739_v16 }
0x1706   :  { %4358 = vmatpush3.msra.mxu1 %v5207_v5  ;;  %4359 = vmatprep.mubr.msk.f32.mxu1 %vm4740_vm3, %v4739_v16 }
0x1707   :  { %4363 = vmatpush3.msk.msra.mxu0 %vm442_vm2, %v5197_v19  ;;  %4364 = vmatprep.mubr.msk.f32.mxu0 %vm4740_vm3, %v4739_v16 }
0x1708   :  { %4367 = vmatprep.subr.mxu1 %v4739_v16  ;;  %4372 = vmatprep.subr.mxu0 %v4739_v16 }
0x1709   :  { %4360 = vmatmul.mubr.f32.vlgmr.msra.gmra.mrb[22].mxu1 %v4739_v16 }
0x170a   :  { %4368 = vmatpush3.msra.mxu1 %v5207_v5  ;;  %4369 = vmatprep.mubr.msk.f32.mxu1 %vm4740_vm3, %v4739_v16 }
0x170b   :  { %4377 = vmatprep.subr.mxu1 %v4739_v16 }
0x17d4   :  { %v4346_v9 = vpop.f32.mrb[20].mxu0 }
0x17d5   :  { %v5229_v10 = vadd.f32 %v4346_v9, %v4097_v8  ;;  %v2225_v11 = vpop.f32.mrb[21].mxu0 }
0x17d6   :  { %v5231_v12 = vadd.f32 %v4097_v8, %v2225_v11 }
0x17d8   :  { %v4351_v15 = vpop.f32.mrb[20].mxu1  ;;  %v2394_v17 = vpop.f32.mrb[22].mxu0 }
0x17d9   :  { %v5236_v18 = vadd.f32 %v4351_v15, %v4101_v13  ;;  %v2398_v20 = vadd.f32 %v2394_v17, %v5231_v12  ;;  %v2316_v21 = vpop.f32.mrb[21].mxu1  ;;  %v4356_v22 = vpop.f32.mrb[23].mxu0 }
0x17da   :  { %v5239_v23 = vadd.f32 %v4101_v13, %v2316_v21 }
0x17db   :  { %4586 = vtanh.f32 %v2398_v20  ;;  %v4105_v30 = vmul.f32 -1.442695, %v2398_v20 }
0x17dc   :  { %v2489_v24 = vpop.f32.mrb[22].mxu1 }
0x17dd   :  { %v2493_v25 = vadd.f32 %v2489_v24, %v5239_v23  ;;  %v4361_v26 = vpop.f32.mrb[23].mxu1 }
0x17df   :  { %4588 = vtanh.f32 %v2493_v25  ;;  %v4106_v31 = vmul.f32 -1.442695, %v2493_v25 }
0x17e0   :  { %4590 = vpow2.f32 %v4105_v30 }
0x17e1   :  { %4592 = vpow2.f32 %v4106_v31 }
0x17e5   :  { %v4587_v37 = vpop.eup %4586 }
0x17e6   :  { %2408 = vrot.lane.b32.xlu0 %v4587_v37, %s4741_s5 }
0x17e9   :  { %v4589_v29 = vpop.eup %4588 }
0x17ea   :  { %2503 = vrot.lane.b32.xlu1 %v4589_v29, %s4742_s13  ;;  %v4591_v32 = vpop.eup %4590 }
0x17eb   :  { %v2402_v34 = vadd.f32 1.0, %v4591_v32  ;;  %v4593_v58 = vpop.eup %4592 }
0x17ec   :  { %v2497_v36 = vadd.f32 1.0, %v4593_v58 }
0x17ed   :  { %4594 = vrcp.f32 %v2402_v34 }
0x17ee   :  { %4596 = vrcp.f32 %v2497_v36 }
0x17f7   :  { %v4595_v39 = vpop.eup %4594 }
0x17f8   :  { %v4597_v42 = vpop.eup %4596  ;;  %v2406_v6 = vmul.f32 0.0, %v4595_v39 }
0x17f9   :  { %v2501_v45 = vmul.f32 0.0, %v4597_v42 }
0x1858   :  { %v2409_v40 = vpop.permute.xlu0 %2408 }
0x1859   :  { %v2411_v41 = vmul.f32 %v4595_v39, %v2409_v40 }
0x185b   :  { %2413 = vrot.lane.b32.xlu0 %v2411_v41, %s4743_s23 }
0x185c   :  { %v2504_v43 = vpop.permute.xlu1 %2503 }
0x185d   :  { %v2506_v4 = vmul.f32 %v4597_v42, %v2504_v43 }
0x185f   :  { %2508 = vrot.lane.b32.xlu1 %v2506_v4, %s4744_s24 }
0x18cd   :  { %v2414_v33 = vpop.permute.xlu0 %2413 }
0x18ce   :  { %v2416_v44 = vadd.f32 %v2414_v33, %v2406_v6 }
0x18d0   :  { %4598 = vtanh.f32 %v2416_v44  ;;  %v2605_v17 = vrot.slane %v2416_v44, 6 }
0x18d1   :  { %v2509_v46 = vpop.permute.xlu1 %2508 }
0x18d2   :  { %v2511_v35 = vadd.f32 %v2509_v46, %v2501_v45 }
0x18d4   :  { %4600 = vtanh.f32 %v2511_v35  ;;  %v2711_v22 = vrot.slane %v2511_v35, 6 }
0x18da   :  { %v4599_v47 = vpop.eup %4598 }
0x18db   :  { %2419 = vrot.lane.b32.xlu0 %v4599_v47, %s4744_s24 }
0x18de   :  { %v4601_v48 = vpop.eup %4600 }
0x18df   :  { %2514 = vrot.lane.b32.xlu1 %v4601_v48, %s4745_s25 }
0x194d   :  { %v2420_v49 = vpop.permute.xlu0 %2419 }
0x194e   :  { %v5248_v50 = vmul.f32 %v4595_v39, %v2420_v49 }
0x1950   :  { %2519 = vrot.lane.b32.xlu0 %v5248_v50, %s4746_s26 }
0x1951   :  { %v2515_v27 = vpop.permute.xlu1 %2514 }
0x1952   :  { %v5252_v51 = vmul.f32 %v4597_v42, %v2515_v27 }
0x1954   :  { %2625 = vrot.lane.b32.xlu1 %v5252_v51, %s4747_s27 }
0x19c2   :  { %v2520_v52 = vpop.permute.xlu0 %2519 }
0x19c3   :  { %4365 = vmatmul.mubr.msk.f32.vlgmr.msra.gmra.mrb[24].mxu0 %vm438_vm4, %v2520_v52 }
0x19c4   :  { %4373 = vmatpush3.msk.msra.mxu0 %vm442_vm2, %v5197_v19  ;;  %4374 = vmatprep.mubr.msk.f32.mxu0 %vm4740_vm3, %v4739_v16 }
0x19c5   :  { %4382 = vmatprep.subr.mxu0 %v4739_v16 }
0x19c6   :  { %v2626_v53 = vpop.permute.xlu1 %2625 }
0x19c7   :  { %4370 = vmatmul.mubr.msk.f32.vlgmr.msra.gmra.mrb[24].mxu1 %vm100_vm0, %v2626_v53 }
0x19c8   :  { %4378 = vmatpush3.msra.mxu1 %v5207_v5  ;;  %4379 = vmatprep.mubr.msk.f32.mxu1 %vm4740_vm3, %v4739_v16 }
0x19c9   :  { %4387 = vmatprep.subr.mxu1 %v4739_v16 }
0x1a96   :  { %v2589_v28 = vpop.f32.mrb[24].mxu0 }
0x1a97   :  { %v2594_v54 = vrot.slane %v2589_v28, 6  ;;  %v4366_v55 = vpop.f32.mrb[25].mxu0 }
0x1a99   :  { %v2596_v56 = vadd.f32 %v2594_v54, %v5231_v12 }
0x1a9a   :  { %v2695_v57 = vpop.f32.mrb[24].mxu1 }
0x1a9b   :  { %4602 = vtanh.f32 %v2596_v56  ;;  %v2700_v59 = vrot.slane %v2695_v57, 6  ;;  %v4371_v38 = vpop.f32.mrb[25].mxu1  ;;  %v4109_v63 = vmul.f32 -1.442695, %v2596_v56 }
0x1a9d   :  { %v2702_v60 = vadd.f32 %v2700_v59, %v5239_v23 }
0x1a9f   :  { %4604 = vtanh.f32 %v2702_v60  ;;  %v4111_v0 = vmul.f32 -1.442695, %v2702_v60 }
0x1aa0   :  { %4606 = vpow2.f32 %v4109_v63 }
0x1aa1   :  { %4608 = vpow2.f32 %v4111_v0 }
0x1aa5   :  { %v4603_v61 = vpop.eup %4602 }
0x1aa6   :  { %2609 = vrot.lane.b32.xlu0 %v4603_v61, %s4741_s5 }
0x1aa9   :  { %v4605_v62 = vpop.eup %4604 }
0x1aaa   :  { %2715 = vrot.lane.b32.xlu1 %v4605_v62, %s4742_s13  ;;  %v4607_v1 = vpop.eup %4606 }
0x1aab   :  { %v2600_v2 = vadd.f32 1.0, %v4607_v1  ;;  %v4609_v14 = vpop.eup %4608 }
0x1aac   :  { %v2706_v3 = vadd.f32 1.0, %v4609_v14 }
0x1aad   :  { %4610 = vrcp.f32 %v2600_v2 }
0x1aae   :  { %4612 = vrcp.f32 %v2706_v3 }
0x1ab7   :  { %v4611_v7 = vpop.eup %4610 }
0x1ab8   :  { %v4613_v11 = vpop.eup %4612  ;;  %v2607_v20 = vmul.f32 %v4611_v7, %v2605_v17 }
0x1ab9   :  { %v2713_v25 = vmul.f32 %v4613_v11, %v2711_v22 }
0x1b18   :  { %v2610_v8 = vpop.permute.xlu0 %2609 }
0x1b19   :  { %v2612_v9 = vmul.f32 %v4611_v7, %v2610_v8 }
0x1b1b   :  { %2614 = vrot.lane.b32.xlu0 %v2612_v9, %s4743_s23 }
0x1b1c   :  { %v2716_v13 = vpop.permute.xlu1 %2715 }
0x1b1d   :  { %v2718_v15 = vmul.f32 %v4613_v11, %v2716_v13 }
0x1b1f   :  { %2720 = vrot.lane.b32.xlu1 %v2718_v15, %s4744_s24 }
0x1b8d   :  { %v2615_v21 = vpop.permute.xlu0 %2614 }
0x1b8e   :  { %v2617_v24 = vadd.f32 %v2615_v21, %v2607_v20 }
0x1b90   :  { %4614 = vtanh.f32 %v2617_v24  ;;  %v2818_v60 = vrot.slane %v2617_v24, 6 }
0x1b91   :  { %v2721_v26 = vpop.permute.xlu1 %2720 }
0x1b92   :  { %v5273_v37 = vadd.f32 %v2721_v26, %v2713_v25 }
0x1b94   :  { %4616 = vtanh.f32 %v5273_v37  ;;  %v2925_v63 = vrot.slane %v5273_v37, 6 }
0x1b9a   :  { %v4615_v29 = vpop.eup %4614 }
0x1b9b   :  { %2620 = vrot.lane.b32.xlu0 %v4615_v29, %s4744_s24 }
0x1b9e   :  { %v4617_v30 = vpop.eup %4616 }
0x1b9f   :  { %2726 = vrot.lane.b32.xlu1 %v4617_v30, %s4745_s25 }
0x1c0d   :  { %v2621_v31 = vpop.permute.xlu0 %2620 }
0x1c0e   :  { %v5278_v32 = vmul.f32 %v4611_v7, %v2621_v31 }
0x1c10   :  { %v2731_v34 = vrot.slane %v5278_v32, 2 }
0x1c11   :  { %v2727_v58 = vpop.permute.xlu1 %2726 }
0x1c12   :  { %v5281_v36 = vmul.f32 %v4613_v11, %v2727_v58  ;;  %2732 = vrot.lane.b32.xlu0 %v2731_v34, %s4746_s26  ;;  %v4006_v11 = vsel %vm2126_vm5, %v5248_v50, %v5278_v32 }
0x1c14   :  { %v2838_v39 = vrot.slane %v5281_v36, 2  ;;  %v4012_v21 = vsel %vm2126_vm5, %v5252_v51, %v5281_v36 }
0x1c16   :  { %2839 = vrot.lane.b32.xlu1 %v2838_v39, %s4747_s27 }
0x1c84   :  { %v2733_v40 = vpop.permute.xlu0 %2732 }
0x1c85   :  { %4375 = vmatmul.mubr.msk.f32.vlgmr.msra.gmra.mrb[26].mxu0 %vm438_vm4, %v2733_v40 }
0x1c86   :  { %4383 = vmatpush3.msk.msra.mxu0 %vm442_vm2, %v5197_v19  ;;  %4384 = vmatprep.mubr.msk.f32.mxu0 %vm4740_vm3, %v4739_v16 }
0x1c87   :  { %4392 = vmatprep.subr.mxu0 %v4739_v16 }
0x1c88   :  { %v2840_v41 = vpop.permute.xlu1 %2839 }
0x1c89   :  { %4380 = vmatmul.mubr.msk.f32.vlgmr.msra.gmra.mrb[26].mxu1 %vm100_vm0, %v2840_v41 }
0x1c8a   :  { %4388 = vmatpush3.msra.mxu1 %v5207_v5  ;;  %4389 = vmatprep.mubr.msk.f32.mxu1 %vm4740_vm3, %v4739_v16 }
0x1c8b   :  { %4397 = vmatprep.subr.mxu1 %v4739_v16 }
0x1d58   :  { %v2802_v42 = vpop.f32.mrb[26].mxu0 }
0x1d59   :  { %v2807_v43 = vrot.slane %v2802_v42, 4  ;;  %v4376_v4 = vpop.f32.mrb[27].mxu0 }
0x1d5b   :  { %v2809_v6 = vadd.f32 %v2807_v43, %v5231_v12 }
0x1d5c   :  { %v2909_v33 = vpop.f32.mrb[26].mxu1 }
0x1d5d   :  { %4618 = vtanh.f32 %v2809_v6  ;;  %v2914_v44 = vrot.slane %v2909_v33, 4  ;;  %v4381_v45 = vpop.f32.mrb[27].mxu1  ;;  %v4114_v48 = vmul.f32 -1.442695, %v2809_v6 }
0x1d5f   :  { %v2916_v46 = vadd.f32 %v2914_v44, %v5239_v23 }
0x1d61   :  { %4620 = vtanh.f32 %v2916_v46  ;;  %v4116_v49 = vmul.f32 -1.442695, %v2916_v46 }
0x1d62   :  { %4622 = vpow2.f32 %v4114_v48 }
0x1d63   :  { %4624 = vpow2.f32 %v4116_v49 }
0x1d67   :  { %v4619_v35 = vpop.eup %4618 }
0x1d68   :  { %2822 = vrot.lane.b32.xlu0 %v4619_v35, %s4741_s5 }
0x1d6b   :  { %v4621_v47 = vpop.eup %4620 }
0x1d6c   :  { %2929 = vrot.lane.b32.xlu1 %v4621_v47, %s4742_s13  ;;  %v4623_v27 = vpop.eup %4622 }
0x1d6d   :  { %v2813_v52 = vadd.f32 1.0, %v4623_v27  ;;  %v4625_v53 = vpop.eup %4624 }
0x1d6e   :  { %v2920_v28 = vadd.f32 1.0, %v4625_v53 }
0x1d6f   :  { %4626 = vrcp.f32 %v2813_v52 }
0x1d70   :  { %4628 = vrcp.f32 %v2920_v28 }
0x1d79   :  { %v4627_v54 = vpop.eup %4626 }
0x1d7a   :  { %v4629_v57 = vpop.eup %4628  ;;  %v2820_v61 = vmul.f32 %v4627_v54, %v2818_v60 }
0x1d7b   :  { %v2927_v1 = vmul.f32 %v4629_v57, %v2925_v63 }
0x1dda   :  { %v2823_v55 = vpop.permute.xlu0 %2822 }
0x1ddb   :  { %v2825_v56 = vmul.f32 %v4627_v54, %v2823_v55 }
0x1ddd   :  { %2827 = vrot.lane.b32.xlu0 %v2825_v56, %s4743_s23 }
0x1dde   :  { %v2930_v59 = vpop.permute.xlu1 %2929 }
0x1ddf   :  { %v2932_v38 = vmul.f32 %v4629_v57, %v2930_v59 }
0x1de1   :  { %2934 = vrot.lane.b32.xlu1 %v2932_v38, %s4744_s24 }
0x1e4f   :  { %v2828_v62 = vpop.permute.xlu0 %2827 }
0x1e50   :  { %v5304_v0 = vadd.f32 %v2828_v62, %v2820_v61 }
0x1e52   :  { %4630 = vtanh.f32 %v5304_v0  ;;  %v3032_v46 = vrot.slane %v5304_v0, 6 }
0x1e53   :  { %v2935_v2 = vpop.permute.xlu1 %2934 }
0x1e54   :  { %v5307_v14 = vadd.f32 %v2935_v2, %v2927_v1 }
0x1e56   :  { %4632 = vtanh.f32 %v5307_v14  ;;  %v3139_v48 = vrot.slane %v5307_v14, 6 }
0x1e5c   :  { %v4631_v3 = vpop.eup %4630 }
0x1e5d   :  { %2833 = vrot.lane.b32.xlu0 %v4631_v3, %s4744_s24 }
0x1e60   :  { %v4633_v7 = vpop.eup %4632 }
0x1e61   :  { %2940 = vrot.lane.b32.xlu1 %v4633_v7, %s4745_s25 }
0x1ecf   :  { %v2834_v8 = vpop.permute.xlu0 %2833 }
0x1ed0   :  { %v2836_v9 = vmul.f32 %v4627_v54, %v2834_v8 }
0x1ed2   :  { %v2945_v13 = vrot.slane %v2836_v9, 4  ;;  %v5316_v15 = vsel %vm442_vm2, %v4006_v11, %v2836_v9 }
0x1ed3   :  { %v2941_v17 = vpop.permute.xlu1 %2940 }
0x1ed4   :  { %v2943_v20 = vmul.f32 %v4629_v57, %v2941_v17  ;;  %2946 = vrot.lane.b32.xlu0 %v2945_v13, %s4746_s26 }
0x1ed6   :  { %v3052_v22 = vrot.slane %v2943_v20, 4  ;;  %v5323_v24 = vsel %vm442_vm2, %v4012_v21, %v2943_v20 }
0x1ed8   :  { %3053 = vrot.lane.b32.xlu1 %v3052_v22, %s4747_s27 }
0x1f46   :  { %v2947_v25 = vpop.permute.xlu0 %2946 }
0x1f47   :  { %4385 = vmatmul.mubr.msk.f32.vlgmr.msra.gmra.mrb[28].mxu0 %vm438_vm4, %v2947_v25 }
0x1f48   :  { %4393 = vmatpush3.msk.msra.mxu0 %vm442_vm2, %v5197_v19  ;;  %4394 = vmatprep.mubr.msk.f32.mxu0 %vm4740_vm3, %v4739_v16 }
0x1f49   :  { %4402 = vmatprep.subr.mxu0 %v4739_v16 }
0x1f4a   :  { %v3054_v50 = vpop.permute.xlu1 %3053 }
0x1f4b   :  { %4390 = vmatmul.mubr.msk.f32.vlgmr.msra.gmra.mrb[28].mxu1 %vm100_vm0, %v3054_v50 }
0x1f4c   :  { %4398 = vmatpush3.msra.mxu1 %v5207_v5  ;;  %4399 = vmatprep.mubr.msk.f32.mxu1 %vm4740_vm3, %v4739_v16 }
0x1f4d   :  { %4407 = vmatprep.subr.mxu1 %v4739_v16 }
0x201a   :  { %v3016_v51 = vpop.f32.mrb[28].mxu0 }
0x201b   :  { %v3021_v26 = vrot.slane %v3016_v51, 2  ;;  %v4386_v37 = vpop.f32.mrb[29].mxu0 }
0x201d   :  { %v3023_v29 = vadd.f32 %v3021_v26, %v5231_v12 }
0x201e   :  { %v3123_v30 = vpop.f32.mrb[28].mxu1 }
0x201f   :  { %4634 = vtanh.f32 %v3023_v29  ;;  %v3128_v31 = vrot.slane %v3123_v30, 2  ;;  %v4391_v32 = vpop.f32.mrb[29].mxu1  ;;  %v4119_v39 = vmul.f32 -1.442695, %v3023_v29 }
0x2021   :  { %v3130_v34 = vadd.f32 %v3128_v31, %v5239_v23 }
0x2023   :  { %4636 = vtanh.f32 %v3130_v34  ;;  %v4121_v40 = vmul.f32 -1.442695, %v3130_v34 }
0x2024   :  { %4638 = vpow2.f32 %v4119_v39 }
0x2025   :  { %4640 = vpow2.f32 %v4121_v40 }
0x2029   :  { %v4635_v58 = vpop.eup %4634 }
0x202a   :  { %3036 = vrot.lane.b32.xlu0 %v4635_v58, %s4741_s5 }
0x202d   :  { %v4637_v36 = vpop.eup %4636 }
0x202e   :  { %3143 = vrot.lane.b32.xlu1 %v4637_v36, %s4742_s13  ;;  %v4639_v41 = vpop.eup %4638 }
0x202f   :  { %v3027_v42 = vadd.f32 1.0, %v4639_v41  ;;  %v4641_v12 = vpop.eup %4640 }
0x2030   :  { %v3134_v43 = vadd.f32 1.0, %v4641_v12 }
0x2031   :  { %4642 = vrcp.f32 %v3027_v42 }
0x2032   :  { %4644 = vrcp.f32 %v3134_v43 }
0x203b   :  { %v4643_v4 = vpop.eup %4642 }
0x203c   :  { %v4645_v33 = vpop.eup %4644  ;;  %v3034_v35 = vmul.f32 %v4643_v4, %v3032_v46 }
0x203d   :  { %v3141_v27 = vmul.f32 %v4645_v33, %v3139_v48 }
0x209c   :  { %v3037_v6 = vpop.permute.xlu0 %3036 }
0x209d   :  { %v3039_v23 = vmul.f32 %v4643_v4, %v3037_v6 }
0x209f   :  { %3041 = vrot.lane.b32.xlu0 %v3039_v23, %s4743_s23 }
0x20a0   :  { %v3144_v44 = vpop.permute.xlu1 %3143 }
0x20a1   :  { %v3146_v45 = vmul.f32 %v4645_v33, %v3144_v44 }
0x20a3   :  { %3148 = vrot.lane.b32.xlu1 %v3146_v45, %s4744_s24 }
0x2111   :  { %v3042_v47 = vpop.permute.xlu0 %3041 }
0x2112   :  { %v3044_v49 = vadd.f32 %v3042_v47, %v3034_v35 }
0x2114   :  { %4646 = vtanh.f32 %v3044_v49  ;;  %v3243_v29 = vrot.slane %v3044_v49, 6 }
0x2115   :  { %v3149_v52 = vpop.permute.xlu1 %3148 }
0x2116   :  { %v5345_v53 = vadd.f32 %v3149_v52, %v3141_v27 }
0x2118   :  { %4648 = vtanh.f32 %v5345_v53  ;;  %v3347_v32 = vrot.slane %v5345_v53, 6 }
0x211e   :  { %v4647_v28 = vpop.eup %4646 }
0x211f   :  { %3047 = vrot.lane.b32.xlu0 %v4647_v28, %s4744_s24 }
0x2122   :  { %v4649_v54 = vpop.eup %4648 }
0x2123   :  { %3154 = vrot.lane.b32.xlu1 %v4649_v54, %s4745_s25 }
0x2191   :  { %v3048_v55 = vpop.permute.xlu0 %3047 }
0x2192   :  { %v3050_v56 = vmul.f32 %v4643_v4, %v3048_v55 }
0x2194   :  { %v3159_v57 = vrot.slane %v3050_v56, 6  ;;  %v5352_v59 = vsel %vm2129_vm6, %v5316_v15, %v3050_v56 }
0x2195   :  { %v3155_v38 = vpop.permute.xlu1 %3154 }
0x2196   :  { %v3157_v60 = vmul.f32 %v4645_v33, %v3155_v38  ;;  %3160 = vrot.lane.b32.xlu0 %v3159_v57, %s4746_s26 }
0x2198   :  { %v3263_v61 = vrot.slane %v3157_v60, 6  ;;  %v5357_v62 = vsel %vm2129_vm6, %v5323_v24, %v3157_v60 }
0x219a   :  { %3264 = vrot.lane.b32.xlu1 %v3263_v61, %s4747_s27 }
0x2208   :  { %v3161_v63 = vpop.permute.xlu0 %3160 }
0x2209   :  { %4395 = vmatmul.mubr.msk.f32.vlgmr.msra.gmra.mrb[30].mxu0 %vm438_vm4, %v3161_v63 }
0x220a   :  { %4403 = vmatpush3.msk.msra.mxu0 %vm442_vm2, %v5197_v19  ;;  %4404 = vmatprep.mubr.msk.f32.mxu0 %vm4740_vm3, %v4739_v16 }
0x220b   :  { %4412 = vmatprep.subr.mxu0 %v4739_v16 }
0x220c   :  { %v3265_v0 = vpop.permute.xlu1 %3264 }
0x220d   :  { %4400 = vmatmul.mubr.msk.f32.vlgmr.msra.gmra.mrb[30].mxu1 %vm100_vm0, %v3265_v0 }
0x220e   :  { %4408 = vmatpush3.msra.mxu1 %v5207_v5  ;;  %4409 = vmatprep.mubr.msk.f32.mxu1 %vm4740_vm3, %v4739_v16 }
0x220f   :  { %4417 = vmatprep.subr.mxu1 %v4739_v16 }
0x22dc   :  { %v3230_v1 = vpop.f32.mrb[30].mxu0 }
0x22dd   :  { %v3234_v2 = vadd.f32 %v3230_v1, %v5229_v10  ;;  %v4396_v14 = vpop.f32.mrb[31].mxu0 }
0x22df   :  { %4650 = vtanh.f32 %v3234_v2  ;;  %v4124_v13 = vmul.f32 -1.442695, %v3234_v2 }
0x22e0   :  { %v3334_v3 = vpop.f32.mrb[30].mxu1 }
0x22e1   :  { %v3338_v7 = vadd.f32 %v3334_v3, %v5236_v18  ;;  %v4401_v8 = vpop.f32.mrb[31].mxu1 }
0x22e3   :  { %4652 = vtanh.f32 %v3338_v7  ;;  %v4126_v15 = vmul.f32 -1.442695, %v3338_v7 }
0x22e4   :  { %4654 = vpow2.f32 %v4124_v13 }
0x22e5   :  { %4656 = vpow2.f32 %v4126_v15 }
0x22e9   :  { %v4651_v9 = vpop.eup %4650 }
0x22ea   :  { %3247 = vrot.lane.b32.xlu0 %v4651_v9, %s4741_s5 }
0x22ed   :  { %v4653_v11 = vpop.eup %4652 }
0x22ee   :  { %3351 = vrot.lane.b32.xlu1 %v4653_v11, %s4742_s13  ;;  %v4655_v17 = vpop.eup %4654 }
0x22ef   :  { %v3238_v20 = vadd.f32 1.0, %v4655_v17  ;;  %v4657_v21 = vpop.eup %4656 }
0x22f0   :  { %v3342_v22 = vadd.f32 1.0, %v4657_v21 }
0x22f1   :  { %4658 = vrcp.f32 %v3238_v20 }
0x22f2   :  { %4660 = vrcp.f32 %v3342_v22 }
0x22fb   :  { %v4659_v24 = vpop.eup %4658 }
0x22fc   :  { %v4661_v51 = vpop.eup %4660  ;;  %v3245_v30 = vmul.f32 %v4659_v24, %v3243_v29 }
0x22fd   :  { %v3349_v58 = vmul.f32 %v4661_v51, %v3347_v32 }
0x235c   :  { %v3248_v25 = vpop.permute.xlu0 %3247 }
0x235d   :  { %v3250_v50 = vmul.f32 %v4659_v24, %v3248_v25 }
0x235f   :  { %3252 = vrot.lane.b32.xlu0 %v3250_v50, %s4743_s23 }
0x2360   :  { %v3352_v26 = vpop.permute.xlu1 %3351 }
0x2361   :  { %v3354_v37 = vmul.f32 %v4661_v51, %v3352_v26 }
0x2363   :  { %3356 = vrot.lane.b32.xlu1 %v3354_v37, %s4744_s24 }
0x23d1   :  { %v3253_v31 = vpop.permute.xlu0 %3252 }
0x23d2   :  { %v3255_v34 = vadd.f32 %v3253_v31, %v3245_v30 }
0x23d4   :  { %4662 = vtanh.f32 %v3255_v34  ;;  %v3453_v2 = vrot.slane %v3255_v34, 6 }
0x23d5   :  { %v3357_v36 = vpop.permute.xlu1 %3356 }
0x23d6   :  { %v3359_v39 = vadd.f32 %v3357_v36, %v3349_v58 }
0x23d8   :  { %4664 = vtanh.f32 %v3359_v39  ;;  %v3559_v7 = vrot.slane %v3359_v39, 6 }
0x23de   :  { %v4663_v40 = vpop.eup %4662 }
0x23df   :  { %3258 = vrot.lane.b32.xlu0 %v4663_v40, %s4744_s24 }
0x23e2   :  { %v4665_v41 = vpop.eup %4664 }
0x23e3   :  { %3362 = vrot.lane.b32.xlu1 %v4665_v41, %s4745_s25 }
0x2451   :  { %v3259_v42 = vpop.permute.xlu0 %3258 }
0x2452   :  { %v5380_v12 = vmul.f32 %v4659_v24, %v3259_v42 }
0x2454   :  { %3367 = vrot.lane.b32.xlu0 %v5380_v12, %s4746_s26 }
0x2455   :  { %v3363_v43 = vpop.permute.xlu1 %3362 }
0x2456   :  { %v5384_v4 = vmul.f32 %v4661_v51, %v3363_v43 }
0x2458   :  { %3473 = vrot.lane.b32.xlu1 %v5384_v4, %s4747_s27 }
0x24c6   :  { %v3368_v6 = vpop.permute.xlu0 %3367 }
0x24c7   :  { %4405 = vmatmul.mubr.msk.f32.vlgmr.msra.gmra.mrb[32].mxu0 %vm438_vm4, %v3368_v6 }
0x24c8   :  { %4413 = vmatpush3.msk.msra.mxu0 %vm442_vm2, %v5197_v19  ;;  %4414 = vmatprep.mubr.msk.f32.mxu0 %vm4740_vm3, %v4739_v16 }
0x24c9   :  { %4422 = vmatprep.subr.mxu0 %v4739_v16 }
0x24ca   :  { %v3474_v23 = vpop.permute.xlu1 %3473 }
0x24cb   :  { %4410 = vmatmul.mubr.msk.f32.vlgmr.msra.gmra.mrb[32].mxu1 %vm100_vm0, %v3474_v23 }
0x24cc   :  { %4418 = vmatpush3.msra.mxu1 %v5207_v5  ;;  %4419 = vmatprep.mubr.msk.f32.mxu1 %vm4740_vm3, %v4739_v16 }
0x24cd   :  { %4427 = vmatprep.subr.mxu1 %v4739_v16 }
0x259a   :  { %v3437_v33 = vpop.f32.mrb[32].mxu0 }
0x259b   :  { %v3442_v44 = vrot.slane %v3437_v33, 6  ;;  %v4406_v45 = vpop.f32.mrb[33].mxu0 }
0x259d   :  { %v3444_v46 = vadd.f32 %v3442_v44, %v5229_v10 }
0x259e   :  { %v3543_v35 = vpop.f32.mrb[32].mxu1 }
0x259f   :  { %4666 = vtanh.f32 %v3444_v46  ;;  %v3548_v47 = vrot.slane %v3543_v35, 6  ;;  %v4411_v48 = vpop.f32.mrb[33].mxu1  ;;  %v4129_v53 = vmul.f32 -1.442695, %v3444_v46 }
0x25a1   :  { %v3550_v49 = vadd.f32 %v3548_v47, %v5236_v18 }
0x25a3   :  { %4668 = vtanh.f32 %v3550_v49  ;;  %v4131_v28 = vmul.f32 -1.442695, %v3550_v49 }
0x25a4   :  { %4670 = vpow2.f32 %v4129_v53 }
0x25a5   :  { %4672 = vpow2.f32 %v4131_v28 }
0x25a9   :  { %v4667_v27 = vpop.eup %4666 }
0x25aa   :  { %3457 = vrot.lane.b32.xlu0 %v4667_v27, %s4741_s5 }
0x25ad   :  { %v4669_v52 = vpop.eup %4668 }
0x25ae   :  { %3563 = vrot.lane.b32.xlu1 %v4669_v52, %s4742_s13  ;;  %v4671_v54 = vpop.eup %4670 }
0x25af   :  { %v3448_v55 = vadd.f32 1.0, %v4671_v54  ;;  %v4673_v56 = vpop.eup %4672 }
0x25b0   :  { %v3554_v57 = vadd.f32 1.0, %v4673_v56 }
0x25b1   :  { %4674 = vrcp.f32 %v3448_v55 }
0x25b2   :  { %4676 = vrcp.f32 %v3554_v57 }
0x25bb   :  { %v4675_v38 = vpop.eup %4674 }
0x25bc   :  { %v4677_v63 = vpop.eup %4676  ;;  %v3455_v14 = vmul.f32 %v4675_v38, %v3453_v2 }
0x25bd   :  { %v3561_v9 = vmul.f32 %v4677_v63, %v3559_v7 }
0x261c   :  { %v3458_v60 = vpop.permute.xlu0 %3457 }
0x261d   :  { %v3460_v61 = vmul.f32 %v4675_v38, %v3458_v60 }
0x261f   :  { %3462 = vrot.lane.b32.xlu0 %v3460_v61, %s4743_s23 }
0x2620   :  { %v3564_v0 = vpop.permute.xlu1 %3563 }
0x2621   :  { %v3566_v1 = vmul.f32 %v4677_v63, %v3564_v0 }
0x2623   :  { %3568 = vrot.lane.b32.xlu1 %v3566_v1, %s4744_s24 }
0x2691   :  { %v3463_v3 = vpop.permute.xlu0 %3462 }
0x2692   :  { %v3465_v8 = vadd.f32 %v3463_v3, %v3455_v14 }
0x2694   :  { %4678 = vtanh.f32 %v3465_v8  ;;  %v3666_v35 = vrot.slane %v3465_v8, 6 }
0x2695   :  { %v3569_v11 = vpop.permute.xlu1 %3568 }
0x2696   :  { %v3571_v13 = vadd.f32 %v3569_v11, %v3561_v9 }
0x2698   :  { %4680 = vtanh.f32 %v3571_v13  ;;  %v3773_v49 = vrot.slane %v3571_v13, 6 }
0x269e   :  { %v4679_v15 = vpop.eup %4678 }
0x269f   :  { %3468 = vrot.lane.b32.xlu0 %v4679_v15, %s4744_s24 }
0x26a2   :  { %v4681_v17 = vpop.eup %4680 }
0x26a3   :  { %3574 = vrot.lane.b32.xlu1 %v4681_v17, %s4745_s25 }
0x2711   :  { %v3469_v20 = vpop.permute.xlu0 %3468 }
0x2712   :  { %v5407_v21 = vmul.f32 %v4675_v38, %v3469_v20 }
0x2714   :  { %v3579_v22 = vrot.slane %v5407_v21, 2  ;;  %v4009_v38 = vsel %vm2126_vm5, %v5380_v12, %v5407_v21 }
0x2715   :  { %v3575_v24 = vpop.permute.xlu1 %3574 }
0x2716   :  { %v5410_v25 = vmul.f32 %v4677_v63, %v3575_v24  ;;  %3580 = vrot.lane.b32.xlu0 %v3579_v22, %s4746_s26 }
0x2718   :  { %v3686_v50 = vrot.slane %v5410_v25, 2  ;;  %v4015_v1 = vsel %vm2126_vm5, %v5384_v4, %v5410_v25 }
0x271a   :  { %3687 = vrot.lane.b32.xlu1 %v3686_v50, %s4747_s27 }
0x2788   :  { %v3581_v51 = vpop.permute.xlu0 %3580 }
0x2789   :  { %4415 = vmatmul.mubr.msk.f32.vlgmr.msra.gmra.mrb[34].mxu0 %vm438_vm4, %v3581_v51 }
0x278a   :  { %4423 = vmatpush3.msk.msra.mxu0 %vm442_vm2, %v5197_v19  ;;  %4424 = vmatprep.mubr.msk.f32.mxu0 %vm4740_vm3, %v4739_v16 }
0x278c   :  { %v3688_v26 = vpop.permute.xlu1 %3687 }
0x278d   :  { %4420 = vmatmul.mubr.msk.f32.vlgmr.msra.gmra.mrb[34].mxu1 %vm100_vm0, %v3688_v26 }
0x278e   :  { %4428 = vmatpush3.msra.mxu1 %v5207_v5  ;;  %4429 = vmatprep.mubr.msk.f32.mxu1 %vm4740_vm3, %v4739_v16 }
0x285c   :  { %v3650_v37 = vpop.f32.mrb[34].mxu0 }
0x285d   :  { %v3655_v29 = vrot.slane %v3650_v37, 4  ;;  %v4416_v30 = vpop.f32.mrb[35].mxu0 }
0x285f   :  { %v3657_v31 = vadd.f32 %v3655_v29, %v5229_v10 }
0x2860   :  { %v3757_v32 = vpop.f32.mrb[34].mxu1 }
0x2861   :  { %4682 = vtanh.f32 %v3657_v31  ;;  %v3762_v34 = vrot.slane %v3757_v32, 4  ;;  %v4421_v19 = vpop.f32.mrb[35].mxu1  ;;  %v4134_v5 = vmul.f32 -1.442695, %v3657_v31 }
0x2863   :  { %v3764_v58 = vadd.f32 %v3762_v34, %v5236_v18 }
0x2865   :  { %4684 = vtanh.f32 %v3764_v58  ;;  %v4136_v16 = vmul.f32 -1.442695, %v3764_v58 }
0x2866   :  { %4686 = vpow2.f32 %v4134_v5 }
0x2867   :  { %4688 = vpow2.f32 %v4136_v16 }
0x286b   :  { %v4683_v36 = vpop.eup %4682 }
0x286c   :  { %3670 = vrot.lane.b32.xlu0 %v4683_v36, %s4741_s5 }
0x286f   :  { %v4685_v39 = vpop.eup %4684 }
0x2870   :  { %3777 = vrot.lane.b32.xlu1 %v4685_v39, %s4742_s13  ;;  %v4687_v40 = vpop.eup %4686 }
0x2871   :  { %v3661_v41 = vadd.f32 1.0, %v4687_v40  ;;  %v4689_v42 = vpop.eup %4688 }
0x2872   :  { %v3768_v43 = vadd.f32 1.0, %v4689_v42 }
0x2873   :  { %4690 = vrcp.f32 %v3661_v41 }
0x2874   :  { %4692 = vrcp.f32 %v3768_v43 }
0x287d   :  { %v4691_v6 = vpop.eup %4690 }
0x287e   :  { %v4693_v44 = vpop.eup %4692  ;;  %v3668_v47 = vmul.f32 %v4691_v6, %v3666_v35 }
0x287f   :  { %v3775_v52 = vmul.f32 %v4693_v44, %v3773_v49 }
0x28de   :  { %v3671_v23 = vpop.permute.xlu0 %3670 }
0x28df   :  { %v3673_v33 = vmul.f32 %v4691_v6, %v3671_v23 }
0x28e1   :  { %3675 = vrot.lane.b32.xlu0 %v3673_v33, %s4743_s23 }
0x28e2   :  { %v3778_v45 = vpop.permute.xlu1 %3777 }
0x28e3   :  { %v3780_v46 = vmul.f32 %v4693_v44, %v3778_v45 }
0x28e5   :  { %3782 = vrot.lane.b32.xlu1 %v3780_v46, %s4744_s24 }
0x2953   :  { %v3676_v48 = vpop.permute.xlu0 %3675 }
0x2954   :  { %v3678_v27 = vadd.f32 %v3676_v48, %v3668_v47 }
0x2956   :  { %4694 = vtanh.f32 %v3678_v27  ;;  %v3880_v32 = vrot.slane %v3678_v27, 6 }
0x2957   :  { %v3783_v53 = vpop.permute.xlu1 %3782 }
0x2958   :  { %v3785_v28 = vadd.f32 %v3783_v53, %v3775_v52 }
0x295a   :  { %4696 = vtanh.f32 %v3785_v28  ;;  %v3987_v58 = vrot.slane %v3785_v28, 6 }
0x2960   :  { %v4695_v54 = vpop.eup %4694 }
0x2961   :  { %3681 = vrot.lane.b32.xlu0 %v4695_v54, %s4744_s24 }
0x2964   :  { %v4697_v55 = vpop.eup %4696 }
0x2965   :  { %3788 = vrot.lane.b32.xlu1 %v4697_v55, %s4745_s25 }
0x29d3   :  { %v3682_v56 = vpop.permute.xlu0 %3681 }
0x29d4   :  { %v3684_v57 = vmul.f32 %v4691_v6, %v3682_v56 }
0x29d6   :  { %v3793_v60 = vrot.slane %v3684_v57, 4  ;;  %v5436_v61 = vsel %vm442_vm2, %v4009_v38, %v3684_v57 }
0x29d7   :  { %v3789_v63 = vpop.permute.xlu1 %3788 }
0x29d8   :  { %v3791_v0 = vmul.f32 %v4693_v44, %v3789_v63  ;;  %3794 = vrot.lane.b32.xlu0 %v3793_v60, %s4746_s26 }
0x29da   :  { %v3900_v2 = vrot.slane %v3791_v0, 4  ;;  %v5443_v14 = vsel %vm442_vm2, %v4015_v1, %v3791_v0 }
0x29dc   :  { %3901 = vrot.lane.b32.xlu1 %v3900_v2, %s4747_s27 }
0x2a4a   :  { %v3795_v3 = vpop.permute.xlu0 %3794 }
0x2a4b   :  { %4425 = vmatmul.mubr.msk.f32.vlgmr.msra.gmra.mrb[36].mxu0 %vm438_vm4, %v3795_v3 }
0x2a4e   :  { %v3902_v12 = vpop.permute.xlu1 %3901 }
0x2a4f   :  { %4430 = vmatmul.mubr.msk.f32.vlgmr.msra.gmra.mrb[36].mxu1 %vm100_vm0, %v3902_v12 }
0x2b1e   :  { %v3864_v7 = vpop.f32.mrb[36].mxu0 }
0x2b1f   :  { %v3869_v8 = vrot.slane %v3864_v7, 2  ;;  %v4426_v9 = vpop.f32.mrb[37].mxu0 }
0x2b21   :  { %v3871_v11 = vadd.f32 %v3869_v8, %v5229_v10 }
0x2b22   :  { %v3971_v13 = vpop.f32.mrb[36].mxu1 }
0x2b23   :  { %4698 = vtanh.f32 %v3871_v11  ;;  %v3976_v4 = vrot.slane %v3971_v13, 2  ;;  %v4431_v15 = vpop.f32.mrb[37].mxu1  ;;  %v4139_v22 = vmul.f32 -1.442695, %v3871_v11 }
0x2b25   :  { %v3978_v17 = vadd.f32 %v3976_v4, %v5236_v18 }
0x2b27   :  { %4700 = vtanh.f32 %v3978_v17  ;;  %v4141_v24 = vmul.f32 -1.442695, %v3978_v17 }
0x2b28   :  { %4702 = vpow2.f32 %v4139_v22 }
0x2b29   :  { %4704 = vpow2.f32 %v4141_v24 }
0x2b2d   :  { %v4699_v20 = vpop.eup %4698 }
0x2b2e   :  { %3884 = vrot.lane.b32.xlu0 %v4699_v20, %s4741_s5 }
0x2b31   :  { %v4701_v21 = vpop.eup %4700 }
0x2b32   :  { %3991 = vrot.lane.b32.xlu1 %v4701_v21, %s4742_s13  ;;  %v4703_v25 = vpop.eup %4702 }
0x2b33   :  { %v3875_v50 = vadd.f32 1.0, %v4703_v25  ;;  %v4705_v10 = vpop.eup %4704 }
0x2b34   :  { %v3982_v51 = vadd.f32 1.0, %v4705_v10 }
0x2b35   :  { %4706 = vrcp.f32 %v3875_v50 }
0x2b36   :  { %4708 = vrcp.f32 %v3982_v51 }
0x2b3f   :  { %v4707_v26 = vpop.eup %4706 }
0x2b40   :  { %v4709_v29 = vpop.eup %4708  ;;  %v3882_v34 = vmul.f32 %v4707_v26, %v3880_v32 }
0x2b41   :  { %v3989_v39 = vmul.f32 %v4709_v29, %v3987_v58 }
0x2ba0   :  { %v3885_v37 = vpop.permute.xlu0 %3884 }
0x2ba1   :  { %v3887_v18 = vmul.f32 %v4707_v26, %v3885_v37 }
0x2ba3   :  { %3889 = vrot.lane.b32.xlu0 %v3887_v18, %s4743_s23 }
0x2ba4   :  { %v3992_v30 = vpop.permute.xlu1 %3991 }
0x2ba5   :  { %v3994_v31 = vmul.f32 %v4709_v29, %v3992_v30 }
0x2ba7   :  { %3996 = vrot.lane.b32.xlu1 %v3994_v31, %s4744_s24 }
0x2c15   :  { %v3890_v19 = vpop.permute.xlu0 %3889 }
0x2c16   :  { %v3892_v36 = vadd.f32 %v3890_v19, %v3882_v34 }
0x2c18   :  { %4710 = vtanh.f32 %v3892_v36 }
0x2c19   :  { %v3997_v5 = vpop.permute.xlu1 %3996 }
0x2c1a   :  { %v3999_v16 = vadd.f32 %v3997_v5, %v3989_v39 }
0x2c1c   :  { %4712 = vtanh.f32 %v3999_v16 }
0x2c22   :  { %v4711_v40 = vpop.eup %4710 }
0x2c23   :  { %3895 = vrot.lane.b32.xlu0 %v4711_v40, %s4744_s24 }
0x2c26   :  { %v4713_v41 = vpop.eup %4712 }
0x2c27   :  { %4002 = vrot.lane.b32.xlu1 %v4713_v41, %s4745_s25  ;;  %4020 = vrot.lane.b32.xlu0 %v5352_v59, %s4746_s26 }
0x2c2b   :  { %4030 = vrot.lane.b32.xlu0 %v5357_v62, %s4747_s27 }
0x2c95   :  { %v3896_v42 = vpop.permute.xlu0 %3895 }
0x2c96   :  { %v3898_v43 = vmul.f32 %v4707_v26, %v3896_v42 }
0x2c98   :  { %v4011_v6 = vsel %vm2129_vm6, %v5436_v61, %v3898_v43 }
0x2c99   :  { %v4003_v23 = vpop.permute.xlu1 %4002  ;;  %4022 = vrot.lane.b32.xlu1 %v4011_v6, %s4746_s26  ;;  %v4021_v33 = vpop.permute.xlu0 %4020 }
0x2c9a   :  { %v4005_v44 = vmul.f32 %v4709_v29, %v4003_v23  ;;  %4026 = vst.msk [vmem:[%s5499_s17] sm:$0xff] %vm438_vm4, %v4021_v33 }
0x2c9c   :  { %v4017_v59 = vsel %vm2129_vm6, %v5443_v14, %v4005_v44 }
0x2c9d   :  { %4032 = vrot.lane.b32.xlu1 %v4017_v59, %s4747_s27  ;;  %v4031_v62 = vpop.permute.xlu0 %4030 }
0x2c9e   :  { %4036 = vst.msk [vmem:[%s5500_s18] sm:$0xff] %vm100_vm0, %v4031_v62 }
0x2d0b   :  { %v4023_v45 = vpop.permute.xlu1 %4022 }
0x2d0c   :  { %4027 = vst.msk [vmem:[%s5499_s17 + $0x8] sm:$0xff] %vm438_vm4, %v4023_v45 }
0x2d0f   :  { %v4033_v46 = vpop.permute.xlu1 %4032 }
0x2d10   :  { %4037 = vst.msk [vmem:[%s5500_s18 + $0x8] sm:$0xff] %vm100_vm0, %v4033_v46 }
0x2d11   :  { %4046 = vsyncpa [#allocation3], 1 }

</bundles_post_ra>
